<compile_context>
chip_gen: v7x
topology: tpu7x:2x2x1
jax: 0.10.0
libtpu: 0.0.40
codegen_flags: <defaults>
</compile_context>

<pallas_src>
import functools

import jax
import jax.numpy as jnp
from jax import lax
from jax.experimental import pallas as pl
from jax.experimental.pallas import tpu as pltpu

_LANE = 128  # padded feature width (one full lane vreg)


def _round_up(x, m):
    return ((x + m - 1) // m) * m


def _vmem_cap_bytes():
    try:
        return int(pltpu.get_tpu_info().vmem_capacity_bytes)
    except Exception:
        return 64 << 20  # conservative (v7x per-TC)


def _pad2(x, rows, cols):
    return jnp.pad(x, ((0, rows - x.shape[0]), (0, cols - x.shape[1])))


# ---------------------------------------------------------------------------
# Kernels — tiled path
# ---------------------------------------------------------------------------

def _gcn_kernel(a_ref, h_ref, w_ref, b_ref, o_ref, acc_ref, *, block_k, relu):
    """out[i] = act((sum_k A[i,k] @ H[k]) @ W + b); H is VMEM-resident."""
    k = pl.program_id(1)

    @pl.when(k == 0)
    def _():
        acc_ref[...] = jnp.zeros_like(acc_ref)

    start = pl.multiple_of(k * block_k, block_k)
    acc_ref[...] += jnp.dot(a_ref[...], h_ref[pl.ds(start, block_k), :],
                            preferred_element_type=jnp.float32)

    @pl.when(k == pl.num_programs(1) - 1)
    def _():
        out = jnp.dot(acc_ref[...].astype(jnp.bfloat16), w_ref[...],
                      preferred_element_type=jnp.float32) + b_ref[...]
        if relu:
            out = jnp.maximum(out, 0.0)
        o_ref[...] = out.astype(o_ref.dtype)


def _gcn_dual_kernel(a_ref, h_ref, w1_ref, b1_ref, w2_ref, b2_ref,
                     o1_ref, o2_ref, acc_ref, *, block_k):
    """One pass over A for both emb-consuming branches:
       o1 = relu(z @ W1 + b1)   (attr decoder L1)
       o2 =      z @ W2 + b2    (struct decoder GCN),  z = A @ H."""
    k = pl.program_id(1)

    @pl.when(k == 0)
    def _():
        acc_ref[...] = jnp.zeros_like(acc_ref)

    start = pl.multiple_of(k * block_k, block_k)
    acc_ref[...] += jnp.dot(a_ref[...], h_ref[pl.ds(start, block_k), :],
                            preferred_element_type=jnp.float32)

    @pl.when(k == pl.num_programs(1) - 1)
    def _():
        z = acc_ref[...].astype(jnp.bfloat16)
        o1 = jnp.dot(z, w1_ref[...], preferred_element_type=jnp.float32) + b1_ref[...]
        o1_ref[...] = jnp.maximum(o1, 0.0).astype(o1_ref.dtype)
        o2 = jnp.dot(z, w2_ref[...], preferred_element_type=jnp.float32) + b2_ref[...]
        o2_ref[...] = o2.astype(o2_ref.dtype)


def _gram_kernel(h_ref, s_ref, *, block_i, block_j):
    """S[i, j] block = H[i] @ H[j]^T — contraction on dim 1 of both operands
    (no vxpose).  H is VMEM-resident; both slices taken in-kernel."""
    # TODO(synk): exploit symmetry of S (compute only j >= i blocks, mirror write).
    i = pl.program_id(0)
    j = pl.program_id(1)
    hi = h_ref[pl.ds(pl.multiple_of(i * block_i, block_i), block_i), :]
    hj = h_ref[pl.ds(pl.multiple_of(j * block_j, block_j), block_j), :]
    s_ref[...] = lax.dot_general(hi, hj,
                                 dimension_numbers=(((1,), (1,)), ((), ())),
                                 preferred_element_type=jnp.float32)


# ---------------------------------------------------------------------------
# Kernel — fused path (A resident in VMEM, all layers + gram in one call)
# ---------------------------------------------------------------------------

def _fused_kernel(a_ref, x_ref, we1, be1, we2, be2, wd1, bd1, wd2, bd2, ws1, bs1,
                  xo_ref, so_ref, emb_ref):
    a = a_ref[...]

    def gcn(h, w_r, b_r, relu):
        z = jnp.dot(a, h, preferred_element_type=jnp.float32)
        out = jnp.dot(z.astype(jnp.bfloat16), w_r[...],
                      preferred_element_type=jnp.float32) + b_r[...]
        if relu:
            out = jnp.maximum(out, 0.0)
        return out.astype(jnp.bfloat16)

    h1 = gcn(x_ref[...], we1, be1, True)
    emb = gcn(h1, we2, be2, False)
    h2 = gcn(emb, wd1, bd1, True)
    h3 = gcn(emb, ws1, bs1, False)
    x_ = gcn(h2, wd2, bd2, False)

    emb_ref[...] = emb
    xo_ref[...] = x_
    so_ref[...] = lax.dot_general(h3, h3,
                                  dimension_numbers=(((1,), (1,)), ((), ())),
                                  preferred_element_type=jnp.float32)


# ---------------------------------------------------------------------------
# Pallas-call wrappers
# ---------------------------------------------------------------------------

def _gcn_layer(a, h, w, b, *, relu, block_rows, block_k, vmem_limit):
    n_pad = a.shape[0]
    fin = h.shape[1]
    fout = w.shape[1]
    grid = (n_pad // block_rows, n_pad // block_k)
    return pl.pallas_call(
        functools.partial(_gcn_kernel, block_k=block_k, relu=relu),
        out_shape=jax.ShapeDtypeStruct((n_pad, fout), jnp.bfloat16),
        grid=grid,
        in_specs=[
            pl.BlockSpec((block_rows, block_k), lambda i, k: (i, k)),   # A[i, k]
            pl.BlockSpec((n_pad, fin), lambda i, k: (0, 0)),            # H (resident)
            pl.BlockSpec((fin, fout), lambda i, k: (0, 0)),             # W (resident)
            pl.BlockSpec((1, fout), lambda i, k: (0, 0)),               # b (resident)
        ],
        out_specs=pl.BlockSpec((block_rows, fout), lambda i, k: (i, 0)),
        scratch_shapes=[pltpu.VMEM((block_rows, fin), jnp.float32)],
        compiler_params=pltpu.CompilerParams(
            dimension_semantics=("parallel", "arbitrary"),
            vmem_limit_bytes=vmem_limit),
    )(a, h, w, b)


def _gcn_dual_layer(a, h, w1, b1, w2, b2, *, block_rows, block_k, vmem_limit):
    n_pad = a.shape[0]
    fin = h.shape[1]
    f1 = w1.shape[1]
    f2 = w2.shape[1]
    grid = (n_pad // block_rows, n_pad // block_k)
    return pl.pallas_call(
        functools.partial(_gcn_dual_kernel, block_k=block_k),
        out_shape=(jax.ShapeDtypeStruct((n_pad, f1), jnp.bfloat16),
                   jax.ShapeDtypeStruct((n_pad, f2), jnp.bfloat16)),
        grid=grid,
        in_specs=[
            pl.BlockSpec((block_rows, block_k), lambda i, k: (i, k)),   # A[i, k]
            pl.BlockSpec((n_pad, fin), lambda i, k: (0, 0)),            # H (resident)
            pl.BlockSpec((fin, f1), lambda i, k: (0, 0)),
            pl.BlockSpec((1, f1), lambda i, k: (0, 0)),
            pl.BlockSpec((fin, f2), lambda i, k: (0, 0)),
            pl.BlockSpec((1, f2), lambda i, k: (0, 0)),
        ],
        out_specs=[pl.BlockSpec((block_rows, f1), lambda i, k: (i, 0)),
                   pl.BlockSpec((block_rows, f2), lambda i, k: (i, 0))],
        scratch_shapes=[pltpu.VMEM((block_rows, fin), jnp.float32)],
        compiler_params=pltpu.CompilerParams(
            dimension_semantics=("parallel", "arbitrary"),
            vmem_limit_bytes=vmem_limit),
    )(a, h, w1, b1, w2, b2)


def _gram(h, *, block_rows, vmem_limit):
    n_pad, f = h.shape
    grid = (n_pad // block_rows, n_pad // block_rows)
    return pl.pallas_call(
        functools.partial(_gram_kernel, block_i=block_rows, block_j=block_rows),
        out_shape=jax.ShapeDtypeStruct((n_pad, n_pad), jnp.float32),
        grid=grid,
        in_specs=[pl.BlockSpec((n_pad, f), lambda i, j: (0, 0))],       # H (resident)
        out_specs=pl.BlockSpec((block_rows, block_rows), lambda i, j: (i, j)),
        compiler_params=pltpu.CompilerParams(
            dimension_semantics=("parallel", "parallel"),
            vmem_limit_bytes=vmem_limit),
    )(h)


def _fused_forward(a, x, we1, be1, we2, be2, wd1, bd1, wd2, bd2, ws1, bs1, *,
                   vmem_limit):
    n_pad = a.shape[0]
    f = x.shape[1]

    def res(shp):
        return pl.BlockSpec(shp, lambda i: (0, 0))

    in_arrays = (a, x, we1, be1, we2, be2, wd1, bd1, wd2, bd2, ws1, bs1)
    return pl.pallas_call(
        _fused_kernel,
        out_shape=(jax.ShapeDtypeStruct((n_pad, f), jnp.bfloat16),      # x_
                   jax.ShapeDtypeStruct((n_pad, n_pad), jnp.float32),   # s_
                   jax.ShapeDtypeStruct((n_pad, f), jnp.bfloat16)),     # emb
        grid=(1,),
        in_specs=[res(arr.shape) for arr in in_arrays],
        out_specs=[res((n_pad, f)), res((n_pad, n_pad)), res((n_pad, f))],
        compiler_params=pltpu.CompilerParams(
            dimension_semantics=("arbitrary",),
            vmem_limit_bytes=vmem_limit),
    )(*in_arrays)


# ---------------------------------------------------------------------------
# Forward pass
# ---------------------------------------------------------------------------

@functools.partial(jax.jit, static_argnames=("use_fused",))
def graph_ae_forward(a_hat, x, params, use_fused=None):
    n, in_dim = x.shape
    hid = params["We2"].shape[1]
    f = _LANE
    assert in_dim <= f and hid <= f, "feature dims must fit in one 128-lane block"

    # --- static tile-size selection (shapes are static under jit) ----------
    if n <= 512:
        n_pad = _round_up(n, 128)
        block_rows = n_pad
        block_k = n_pad
    else:
        n_pad = _round_up(n, 512)
        block_rows = 512                      # >= 2 row tiles -> both v7x TCs busy
        block_k = 1024 if n_pad % 1024 == 0 else 512

    cap = _vmem_cap_bytes()

    # --- pad to lane-dense / tile-aligned shapes; bf16 big operands --------
    a_bf = _pad2(a_hat, n_pad, n_pad).astype(jnp.bfloat16)
    x_bf = _pad2(x, n_pad, f).astype(jnp.bfloat16)

    def wpad(name):                            # weights bf16 (epilogue matmul)
        return _pad2(params[name], f, f).astype(jnp.bfloat16)

    def bpad(name):                            # biases stay f32
        return _pad2(params[name], 1, f)

    we1, be1 = wpad("We1"), bpad("be1")
    we2, be2 = wpad("We2"), bpad("be2")
    wd1, bd1 = wpad("Wd1"), bpad("bd1")
    wd2, bd2 = wpad("Wd2"), bpad("bd2")
    ws1, bs1 = wpad("Ws1"), bpad("bs1")

    # --- path selection: fused (A resident in VMEM) vs tiled/streamed ------
    fused_bytes = (n_pad * n_pad * 2            # A (bf16)
                   + n_pad * n_pad * 4          # S output (f32)
                   + 10 * n_pad * f * 2         # x + activations + outputs
                   + 5 * (f * f * 2 + f * 4))   # weights / biases
    if use_fused is None:
        use_fused = fused_bytes <= min(40 << 20, int(cap * 0.6))

    if use_fused:
        vmem_limit = int(min(max(fused_bytes + (8 << 20), 32 << 20), int(cap * 0.75)))
        x_pad, s_pad, emb_pad = _fused_forward(
            a_bf, x_bf, we1, be1, we2, be2, wd1, bd1, wd2, bd2, ws1, bs1,
            vmem_limit=vmem_limit)
    else:
        req = (2 * block_rows * block_k * 2        # A tile, double-buffered
               + 2 * n_pad * f * 2                 # resident H (conservative x2)
               + 4 * block_rows * f * 2            # output tiles (dual layer, x2 buf)
               + block_rows * f * 4                # f32 accumulator scratch
               + 2 * block_rows * block_rows * 4   # gram S tile, double-buffered
               + (8 << 20))                        # headroom
        vmem_limit = int(min(max(req, 32 << 20), int(cap * 0.75)))

        h1 = _gcn_layer(a_bf, x_bf, we1, be1, relu=True,
                        block_rows=block_rows, block_k=block_k, vmem_limit=vmem_limit)
        emb_pad = _gcn_layer(a_bf, h1, we2, be2, relu=False,
                             block_rows=block_rows, block_k=block_k,
                             vmem_limit=vmem_limit)
        h2, h3 = _gcn_dual_layer(a_bf, emb_pad, wd1, bd1, ws1, bs1,
                                 block_rows=block_rows, block_k=block_k,
                                 vmem_limit=vmem_limit)
        x_pad = _gcn_layer(a_bf, h2, wd2, bd2, relu=False,
                           block_rows=block_rows, block_k=block_k,
                           vmem_limit=vmem_limit)
        s_pad = _gram(h3, block_rows=block_rows, vmem_limit=vmem_limit)

    x_ = x_pad[:n, :in_dim].astype(jnp.float32)
    s_ = s_pad[:n, :n]
    emb_out = emb_pad[:n, :hid].astype(jnp.float32)
    return x_, s_, emb_out


# ---------------------------------------------------------------------------
# Glue: graph preprocessing, params, reference
# ---------------------------------------------------------------------------

def build_normalized_adjacency(edge_index, num_nodes):
    """Dense GCN-normalized adjacency: D^-1/2 (A + I) D^-1/2 (plain-JAX glue)."""
    src, dst = edge_index[0], edge_index[1]
    a = jnp.zeros((num_nodes, num_nodes), jnp.float32)
    a = a.at[src, dst].add(1.0)
    a = a.at[dst, src].add(1.0)                       # symmetric (undirected)
    a = jnp.minimum(a, 1.0)                           # dedupe duplicate edges
    a = a + jnp.eye(num_nodes, dtype=jnp.float32)     # self loops
    deg = jnp.sum(a, axis=1)
    dinv = jnp.where(deg > 0, 1.0 / jnp.sqrt(deg), 0.0)
    return a * dinv[:, None] * dinv[None, :]


def init_params(key, in_dim, hid_dim):
    """Glorot-style init matching GCNConv weight shapes (in, out); biases (1, out)."""
    ks = jax.random.split(key, 5)

    def glorot(k, fan_in, fan_out):
        scale = jnp.sqrt(6.0 / (fan_in + fan_out))
        return jax.random.uniform(k, (fan_in, fan_out), jnp.float32, -scale, scale)

    return {
        "We1": glorot(ks[0], in_dim, hid_dim), "be1": jnp.zeros((1, hid_dim), jnp.float32),
        "We2": glorot(ks[1], hid_dim, hid_dim), "be2": jnp.zeros((1, hid_dim), jnp.float32),
        "Wd1": glorot(ks[2], hid_dim, hid_dim), "bd1": jnp.zeros((1, hid_dim), jnp.float32),
        "Wd2": glorot(ks[3], hid_dim, in_dim), "bd2": jnp.zeros((1, in_dim), jnp.float32),
        "Ws1": glorot(ks[4], hid_dim, hid_dim), "bs1": jnp.zeros((1, hid_dim), jnp.float32),
    }


def reference_forward(a_hat, x, p):
    """Pure-JAX reference matching the kernel numerics
    (bf16 A / features / weights, f32 accumulation, bf16 layer outputs)."""
    a = a_hat.astype(jnp.bfloat16)

    def gcn(h, w, b, relu):
        z = jnp.dot(a, h.astype(jnp.bfloat16), preferred_element_type=jnp.float32)
        out = jnp.dot(z.astype(jnp.bfloat16), w.astype(jnp.bfloat16),
                      preferred_element_type=jnp.float32) + b
        if relu:
            out = jnp.maximum(out, 0.0)
        return out.astype(jnp.bfloat16).astype(jnp.float32)

    h1 = gcn(x, p["We1"], p["be1"], True)
    emb = gcn(h1, p["We2"], p["be2"], False)
    h2 = gcn(emb, p["Wd1"], p["bd1"], True)
    x_ = gcn(h2, p["Wd2"], p["bd2"], False)
    h3 = gcn(emb, p["Ws1"], p["bs1"], False)
    s_ = lax.dot_general(h3.astype(jnp.bfloat16), h3.astype(jnp.bfloat16),
                         dimension_numbers=(((1,), (1,)), ((), ())),
                         preferred_element_type=jnp.float32)
    return x_, s_, emb


if __name__ == "__main__":
    IN_DIM = 16
    HID_DIM = 64

    def make_case(k, n, e):
        kx, ke, kp = jax.random.split(k, 3)
        x = jax.random.normal(kx, (n, IN_DIM), jnp.float32)
        edge_index = jax.random.randint(ke, (2, e), 0, n, dtype=jnp.int32)
        a_hat = build_normalized_adjacency(edge_index, n)
        params = init_params(kp, IN_DIM, HID_DIM)
        return a_hat, x, params

    k1, k2 = jax.random.split(jax.random.PRNGKey(0))

    # Case 1: small graph -> fused single-kernel path (A resident in VMEM).
    a1, x1, p1 = make_case(k1, 256, 1024)
    out1 = graph_ae_forward(a1, x1, p1)
    jax.block_until_ready(out1)

    # Case 2: larger, non-128-multiple graph -> forced tiled/streamed path
    # (exercises zero-padding, multi-row, multi-k accumulation).
    a2, x2, p2 = make_case(k2, 1200, 4800)
    out2 = graph_ae_forward(a2, x2, p2, use_fused=False)
    jax.block_until_ready(out2)

    for (a, x, p), (x_, s_, emb) in (((a1, x1, p1), out1), ((a2, x2, p2), out2)):
        n = x.shape[0]
        x_ref, s_ref, emb_ref = reference_forward(a, x, p)
        assert x_.shape == (n, IN_DIM) and s_.shape == (n, n) and emb.shape == (n, HID_DIM)
        assert jnp.allclose(x_, x_ref, rtol=5e-2, atol=5e-2)
        assert jnp.allclose(s_, s_ref, rtol=5e-2, atol=5e-2)
        assert jnp.allclose(emb, emb_ref, rtol=5e-2, atol=5e-2)

    print("KERNEL_OK")
</pallas_src>

<mosaic_0001>
module attributes {stable_mosaic.version = 11 : i64} {
  func.func @_fused_kernel(%arg0: i32, %arg1: memref<256x256xbf16, #tpu.memory_space<vmem>>, %arg2: memref<256x128xbf16, #tpu.memory_space<vmem>>, %arg3: memref<128x128xbf16, #tpu.memory_space<vmem>>, %arg4: memref<1x128xf32, #tpu.memory_space<vmem>>, %arg5: memref<128x128xbf16, #tpu.memory_space<vmem>>, %arg6: memref<1x128xf32, #tpu.memory_space<vmem>>, %arg7: memref<128x128xbf16, #tpu.memory_space<vmem>>, %arg8: memref<1x128xf32, #tpu.memory_space<vmem>>, %arg9: memref<128x128xbf16, #tpu.memory_space<vmem>>, %arg10: memref<1x128xf32, #tpu.memory_space<vmem>>, %arg11: memref<128x128xbf16, #tpu.memory_space<vmem>>, %arg12: memref<1x128xf32, #tpu.memory_space<vmem>>, %arg13: memref<256x128xbf16, #tpu.memory_space<vmem>>, %arg14: memref<256x256xf32, #tpu.memory_space<vmem>>, %arg15: memref<256x128xbf16, #tpu.memory_space<vmem>>) attributes {dimension_semantics = [#tpu.dimension_semantics<arbitrary>], iteration_bounds = array<i64: 1>, scalar_prefetch = 0 : i64, scratch_operands = 0 : i64, tpu.core_type = #tpu.core_type<tc>, window_params = [{pipeline_mode = #tpu.pipeline_mode<synchronous>, transform_indices = @transform_0, window_bounds = array<i64: 256, 256>}, {pipeline_mode = #tpu.pipeline_mode<synchronous>, transform_indices = @transform_1, window_bounds = array<i64: 256, 128>}, {pipeline_mode = #tpu.pipeline_mode<synchronous>, transform_indices = @transform_2, window_bounds = array<i64: 128, 128>}, {pipeline_mode = #tpu.pipeline_mode<synchronous>, transform_indices = @transform_3, window_bounds = array<i64: 1, 128>}, {pipeline_mode = #tpu.pipeline_mode<synchronous>, transform_indices = @transform_4, window_bounds = array<i64: 128, 128>}, {pipeline_mode = #tpu.pipeline_mode<synchronous>, transform_indices = @transform_5, window_bounds = array<i64: 1, 128>}, {pipeline_mode = #tpu.pipeline_mode<synchronous>, transform_indices = @transform_6, window_bounds = array<i64: 128, 128>}, {pipeline_mode = #tpu.pipeline_mode<synchronous>, transform_indices = @transform_7, window_bounds = array<i64: 1, 128>}, {pipeline_mode = #tpu.pipeline_mode<synchronous>, transform_indices = @transform_8, window_bounds = array<i64: 128, 128>}, {pipeline_mode = #tpu.pipeline_mode<synchronous>, transform_indices = @transform_9, window_bounds = array<i64: 1, 128>}, {pipeline_mode = #tpu.pipeline_mode<synchronous>, transform_indices = @transform_10, window_bounds = array<i64: 128, 128>}, {pipeline_mode = #tpu.pipeline_mode<synchronous>, transform_indices = @transform_11, window_bounds = array<i64: 1, 128>}, {pipeline_mode = #tpu.pipeline_mode<synchronous>, transform_indices = @transform_12, window_bounds = array<i64: 256, 128>}, {pipeline_mode = #tpu.pipeline_mode<synchronous>, transform_indices = @transform_13, window_bounds = array<i64: 256, 256>}, {pipeline_mode = #tpu.pipeline_mode<synchronous>, transform_indices = @transform_14, window_bounds = array<i64: 256, 128>}]} {
    %c0 = arith.constant 0 : index
    %c0_0 = arith.constant 0 : index
    %0 = vector.load %arg1[%c0, %c0_0] : memref<256x256xbf16, #tpu.memory_space<vmem>>, vector<256x256xbf16>
    %c0_1 = arith.constant 0 : index
    %c0_2 = arith.constant 0 : index
    %1 = vector.load %arg2[%c0_1, %c0_2] : memref<256x128xbf16, #tpu.memory_space<vmem>>, vector<256x128xbf16>
    %cst = arith.constant dense<0.000000e+00> : vector<256x128xf32>
    %2 = tpu.matmul %0, %1, %cst {dimension_numbers = #tpu.dot_dimension_numbers<[1], [0], [0], [1], [0, 0, 1, 1], [], []>} : vector<256x256xbf16>, vector<256x128xbf16>, vector<256x128xf32> -> vector<256x128xf32>
    %3 = arith.truncf %2 : vector<256x128xf32> to vector<256x128xbf16>
    %c0_3 = arith.constant 0 : index
    %c0_4 = arith.constant 0 : index
    %4 = vector.load %arg3[%c0_3, %c0_4] : memref<128x128xbf16, #tpu.memory_space<vmem>>, vector<128x128xbf16>
    %cst_5 = arith.constant dense<0.000000e+00> : vector<256x128xf32>
    %5 = tpu.matmul %3, %4, %cst_5 {dimension_numbers = #tpu.dot_dimension_numbers<[1], [0], [0], [1], [0, 0, 1, 1], [], []>} : vector<256x128xbf16>, vector<128x128xbf16>, vector<256x128xf32> -> vector<256x128xf32>
    %c0_6 = arith.constant 0 : index
    %c0_7 = arith.constant 0 : index
    %6 = vector.load %arg4[%c0_6, %c0_7] : memref<1x128xf32, #tpu.memory_space<vmem>>, vector<1x128xf32>
    %7 = vector.broadcast %6 : vector<1x128xf32> to vector<256x128xf32>
    %8 = arith.addf %5, %7 : vector<256x128xf32>
    %cst_8 = arith.constant 0.000000e+00 : f32
    %9 = vector.broadcast %cst_8 : f32 to vector<256x128xf32>
    %10 = arith.maximumf %8, %9 : vector<256x128xf32>
    %11 = arith.truncf %10 : vector<256x128xf32> to vector<256x128xbf16>
    %cst_9 = arith.constant dense<0.000000e+00> : vector<256x128xf32>
    %12 = tpu.matmul %0, %11, %cst_9 {dimension_numbers = #tpu.dot_dimension_numbers<[1], [0], [0], [1], [0, 0, 1, 1], [], []>} : vector<256x256xbf16>, vector<256x128xbf16>, vector<256x128xf32> -> vector<256x128xf32>
    %13 = arith.truncf %12 : vector<256x128xf32> to vector<256x128xbf16>
    %c0_10 = arith.constant 0 : index
    %c0_11 = arith.constant 0 : index
    %14 = vector.load %arg5[%c0_10, %c0_11] : memref<128x128xbf16, #tpu.memory_space<vmem>>, vector<128x128xbf16>
    %cst_12 = arith.constant dense<0.000000e+00> : vector<256x128xf32>
    %15 = tpu.matmul %13, %14, %cst_12 {dimension_numbers = #tpu.dot_dimension_numbers<[1], [0], [0], [1], [0, 0, 1, 1], [], []>} : vector<256x128xbf16>, vector<128x128xbf16>, vector<256x128xf32> -> vector<256x128xf32>
    %c0_13 = arith.constant 0 : index
    %c0_14 = arith.constant 0 : index
    %16 = vector.load %arg6[%c0_13, %c0_14] : memref<1x128xf32, #tpu.memory_space<vmem>>, vector<1x128xf32>
    %17 = vector.broadcast %16 : vector<1x128xf32> to vector<256x128xf32>
    %18 = arith.addf %15, %17 : vector<256x128xf32>
    %19 = arith.truncf %18 : vector<256x128xf32> to vector<256x128xbf16>
    %cst_15 = arith.constant dense<0.000000e+00> : vector<256x128xf32>
    %20 = tpu.matmul %0, %19, %cst_15 {dimension_numbers = #tpu.dot_dimension_numbers<[1], [0], [0], [1], [0, 0, 1, 1], [], []>} : vector<256x256xbf16>, vector<256x128xbf16>, vector<256x128xf32> -> vector<256x128xf32>
    %21 = arith.truncf %20 : vector<256x128xf32> to vector<256x128xbf16>
    %c0_16 = arith.constant 0 : index
    %c0_17 = arith.constant 0 : index
    %22 = vector.load %arg7[%c0_16, %c0_17] : memref<128x128xbf16, #tpu.memory_space<vmem>>, vector<128x128xbf16>
    %cst_18 = arith.constant dense<0.000000e+00> : vector<256x128xf32>
    %23 = tpu.matmul %21, %22, %cst_18 {dimension_numbers = #tpu.dot_dimension_numbers<[1], [0], [0], [1], [0, 0, 1, 1], [], []>} : vector<256x128xbf16>, vector<128x128xbf16>, vector<256x128xf32> -> vector<256x128xf32>
    %c0_19 = arith.constant 0 : index
    %c0_20 = arith.constant 0 : index
    %24 = vector.load %arg8[%c0_19, %c0_20] : memref<1x128xf32, #tpu.memory_space<vmem>>, vector<1x128xf32>
    %25 = vector.broadcast %24 : vector<1x128xf32> to vector<256x128xf32>
    %26 = arith.addf %23, %25 : vector<256x128xf32>
    %cst_21 = arith.constant 0.000000e+00 : f32
    %27 = vector.broadcast %cst_21 : f32 to vector<256x128xf32>
    %28 = arith.maximumf %26, %27 : vector<256x128xf32>
    %29 = arith.truncf %28 : vector<256x128xf32> to vector<256x128xbf16>
    %cst_22 = arith.constant dense<0.000000e+00> : vector<256x128xf32>
    %30 = tpu.matmul %0, %19, %cst_22 {dimension_numbers = #tpu.dot_dimension_numbers<[1], [0], [0], [1], [0, 0, 1, 1], [], []>} : vector<256x256xbf16>, vector<256x128xbf16>, vector<256x128xf32> -> vector<256x128xf32>
    %31 = arith.truncf %30 : vector<256x128xf32> to vector<256x128xbf16>
    %c0_23 = arith.constant 0 : index
    %c0_24 = arith.constant 0 : index
    %32 = vector.load %arg11[%c0_23, %c0_24] : memref<128x128xbf16, #tpu.memory_space<vmem>>, vector<128x128xbf16>
    %cst_25 = arith.constant dense<0.000000e+00> : vector<256x128xf32>
    %33 = tpu.matmul %31, %32, %cst_25 {dimension_numbers = #tpu.dot_dimension_numbers<[1], [0], [0], [1], [0, 0, 1, 1], [], []>} : vector<256x128xbf16>, vector<128x128xbf16>, vector<256x128xf32> -> vector<256x128xf32>
    %c0_26 = arith.constant 0 : index
    %c0_27 = arith.constant 0 : index
    %34 = vector.load %arg12[%c0_26, %c0_27] : memref<1x128xf32, #tpu.memory_space<vmem>>, vector<1x128xf32>
    %35 = vector.broadcast %34 : vector<1x128xf32> to vector<256x128xf32>
    %36 = arith.addf %33, %35 : vector<256x128xf32>
    %37 = arith.truncf %36 : vector<256x128xf32> to vector<256x128xbf16>
    %cst_28 = arith.constant dense<0.000000e+00> : vector<256x128xf32>
    %38 = tpu.matmul %0, %29, %cst_28 {dimension_numbers = #tpu.dot_dimension_numbers<[1], [0], [0], [1], [0, 0, 1, 1], [], []>} : vector<256x256xbf16>, vector<256x128xbf16>, vector<256x128xf32> -> vector<256x128xf32>
    %39 = arith.truncf %38 : vector<256x128xf32> to vector<256x128xbf16>
    %c0_29 = arith.constant 0 : index
    %c0_30 = arith.constant 0 : index
    %40 = vector.load %arg9[%c0_29, %c0_30] : memref<128x128xbf16, #tpu.memory_space<vmem>>, vector<128x128xbf16>
    %cst_31 = arith.constant dense<0.000000e+00> : vector<256x128xf32>
    %41 = tpu.matmul %39, %40, %cst_31 {dimension_numbers = #tpu.dot_dimension_numbers<[1], [0], [0], [1], [0, 0, 1, 1], [], []>} : vector<256x128xbf16>, vector<128x128xbf16>, vector<256x128xf32> -> vector<256x128xf32>
    %c0_32 = arith.constant 0 : index
    %c0_33 = arith.constant 0 : index
    %42 = vector.load %arg10[%c0_32, %c0_33] : memref<1x128xf32, #tpu.memory_space<vmem>>, vector<1x128xf32>
    %43 = vector.broadcast %42 : vector<1x128xf32> to vector<256x128xf32>
    %44 = arith.addf %41, %43 : vector<256x128xf32>
    %45 = arith.truncf %44 : vector<256x128xf32> to vector<256x128xbf16>
    %c0_34 = arith.constant 0 : index
    %c0_35 = arith.constant 0 : index
    %46 = vector.load %arg15[%c0_34, %c0_35] : memref<256x128xbf16, #tpu.memory_space<vmem>>, vector<256x128xbf16>
    tpu.vector_store %arg15[%c0_34, %c0_35], %19 {strides = array<i32>} : memref<256x128xbf16, #tpu.memory_space<vmem>>, vector<256x128xbf16>,
    %c0_36 = arith.constant 0 : index
    %c0_37 = arith.constant 0 : index
    %47 = vector.load %arg13[%c0_36, %c0_37] : memref<256x128xbf16, #tpu.memory_space<vmem>>, vector<256x128xbf16>
    tpu.vector_store %arg13[%c0_36, %c0_37], %45 {strides = array<i32>} : memref<256x128xbf16, #tpu.memory_space<vmem>>, vector<256x128xbf16>,
    %cst_38 = arith.constant dense<0.000000e+00> : vector<256x256xf32>
    %48 = tpu.matmul %37, %37, %cst_38 {dimension_numbers = #tpu.dot_dimension_numbers<[1], [1], [0], [0], [0, 0, 1, 0], [], []>} : vector<256x128xbf16>, vector<256x128xbf16>, vector<256x256xf32> -> vector<256x256xf32>
    %c0_39 = arith.constant 0 : index
    %c0_40 = arith.constant 0 : index
    %49 = vector.load %arg14[%c0_39, %c0_40] : memref<256x256xf32, #tpu.memory_space<vmem>>, vector<256x256xf32>
    tpu.vector_store %arg14[%c0_39, %c0_40], %48 {strides = array<i32>} : memref<256x256xf32, #tpu.memory_space<vmem>>, vector<256x256xf32>,
    return
  }
  func.func @transform_0(%arg0: i32) -> (i32, i32) {
    %c0_i32 = arith.constant 0 : i32
    %c0_i32_0 = arith.constant 0 : i32
    %c0_i32_1 = arith.constant 0 : i32
    return %c0_i32, %c0_i32_0 : i32, i32
  }
  func.func @transform_1(%arg0: i32) -> (i32, i32) {
    %c0_i32 = arith.constant 0 : i32
    %c0_i32_0 = arith.constant 0 : i32
    %c0_i32_1 = arith.constant 0 : i32
    return %c0_i32, %c0_i32_0 : i32, i32
  }
  func.func @transform_2(%arg0: i32) -> (i32, i32) {
    %c0_i32 = arith.constant 0 : i32
    %c0_i32_0 = arith.constant 0 : i32
    %c0_i32_1 = arith.constant 0 : i32
    return %c0_i32, %c0_i32_0 : i32, i32
  }
  func.func @transform_3(%arg0: i32) -> (i32, i32) {
    %c0_i32 = arith.constant 0 : i32
    %c0_i32_0 = arith.constant 0 : i32
    %c0_i32_1 = arith.constant 0 : i32
    return %c0_i32, %c0_i32_0 : i32, i32
  }
  func.func @transform_4(%arg0: i32) -> (i32, i32) {
    %c0_i32 = arith.constant 0 : i32
    %c0_i32_0 = arith.constant 0 : i32
    %c0_i32_1 = arith.constant 0 : i32
    return %c0_i32, %c0_i32_0 : i32, i32
  }
  func.func @transform_5(%arg0: i32) -> (i32, i32) {
    %c0_i32 = arith.constant 0 : i32
    %c0_i32_0 = arith.constant 0 : i32
    %c0_i32_1 = arith.constant 0 : i32
    return %c0_i32, %c0_i32_0 : i32, i32
  }
  func.func @transform_6(%arg0: i32) -> (i32, i32) {
    %c0_i32 = arith.constant 0 : i32
    %c0_i32_0 = arith.constant 0 : i32
    %c0_i32_1 = arith.constant 0 : i32
    return %c0_i32, %c0_i32_0 : i32, i32
  }
  func.func @transform_7(%arg0: i32) -> (i32, i32) {
    %c0_i32 = arith.constant 0 : i32
    %c0_i32_0 = arith.constant 0 : i32
    %c0_i32_1 = arith.constant 0 : i32
    return %c0_i32, %c0_i32_0 : i32, i32
  }
  func.func @transform_8(%arg0: i32) -> (i32, i32) {
    %c0_i32 = arith.constant 0 : i32
    %c0_i32_0 = arith.constant 0 : i32
    %c0_i32_1 = arith.constant 0 : i32
    return %c0_i32, %c0_i32_0 : i32, i32
  }
  func.func @transform_9(%arg0: i32) -> (i32, i32) {
    %c0_i32 = arith.constant 0 : i32
    %c0_i32_0 = arith.constant 0 : i32
    %c0_i32_1 = arith.constant 0 : i32
    return %c0_i32, %c0_i32_0 : i32, i32
  }
  func.func @transform_10(%arg0: i32) -> (i32, i32) {
    %c0_i32 = arith.constant 0 : i32
    %c0_i32_0 = arith.constant 0 : i32
    %c0_i32_1 = arith.constant 0 : i32
    return %c0_i32, %c0_i32_0 : i32, i32
  }
  func.func @transform_11(%arg0: i32) -> (i32, i32) {
    %c0_i32 = arith.constant 0 : i32
    %c0_i32_0 = arith.constant 0 : i32
    %c0_i32_1 = arith.constant 0 : i32
    return %c0_i32, %c0_i32_0 : i32, i32
  }
  func.func @transform_12(%arg0: i32) -> (i32, i32) {
    %c0_i32 = arith.constant 0 : i32
    %c0_i32_0 = arith.constant 0 : i32
    %c0_i32_1 = arith.constant 0 : i32
    return %c0_i32, %c0_i32_0 : i32, i32
  }
  func.func @transform_13(%arg0: i32) -> (i32, i32) {
    %c0_i32 = arith.constant 0 : i32
    %c0_i32_0 = arith.constant 0 : i32
    %c0_i32_1 = arith.constant 0 : i32
    return %c0_i32, %c0_i32_0 : i32, i32
  }
  func.func @transform_14(%arg0: i32) -> (i32, i32) {
    %c0_i32 = arith.constant 0 : i32
    %c0_i32_0 = arith.constant 0 : i32
    %c0_i32_1 = arith.constant 0 : i32
    return %c0_i32, %c0_i32_0 : i32, i32
  }
}

</mosaic_0001>

<bundles_post_ra>
// kernel: graph_ae_forward.1
= control target key start
LH: loop header
LB: loop body
LE: loop exit
PB: predicated region body
PF: predicated region fallthrough
CT: control target
= control target key end

     0   :  { %s5543_s0 = inlined_call_operand.vmem [shape: bf16[256,256], index: 0, kind: input, shape index: {}]   ;;  %s5544_s1 = inlined_call_operand.vmem [shape: bf16[256,128], index: 1, kind: input, shape index: {}]   ;;  %s5545_s2 = inlined_call_operand.vmem [shape: bf16[128,128], index: 2, kind: input, shape index: {}]   ;;  %s5546_s3 = inlined_call_operand.vmem [shape: f32[1,128], index: 3, kind: input, shape index: {}]   ;;  %s5547_s4 = inlined_call_operand.vmem [shape: bf16[128,128], index: 4, kind: input, shape index: {}]   ;;  %s5548_s5 = inlined_call_operand.vmem [shape: f32[1,128], index: 5, kind: input, shape index: {}]   ;;  %s5549_s6 = inlined_call_operand.vmem [shape: bf16[128,128], index: 6, kind: input, shape index: {}]   ;;  %s5550_s7 = inlined_call_operand.vmem [shape: f32[1,128], index: 7, kind: input, shape index: {}]   ;;  %s5551_s8 = inlined_call_operand.vmem [shape: bf16[128,128], index: 8, kind: input, shape index: {}]   ;;  %s5552_s9 = inlined_call_operand.vmem [shape: f32[1,128], index: 9, kind: input, shape index: {}]   ;;  %s5553_s10 = inlined_call_operand.vmem [shape: bf16[128,128], index: 10, kind: input, shape index: {}]   ;;  %s5554_s11 = inlined_call_operand.vmem [shape: f32[1,128], index: 11, kind: input, shape index: {}]   ;;  %s5555_s12 = inlined_call_operand.vmem [shape: bf16[256,128], index: 12, kind: output, shape index: {0}]   ;;  %s5556_s13 = inlined_call_operand.hbm [shape: f32[256,256], index: 13, kind: output, shape index: {1}]   ;;  %s5557_s14 = inlined_call_operand.vmem [shape: bf16[256,128], index: 14, kind: output, shape index: {2}]  }
   0x1   :  { %v4233_v0 = vld [vmem:[%s5544_s1 + $0x40] sm:$0xff]   ;;  %v4235_v2 = vld [vmem:[%s5544_s1 + $0x48] sm:$0xff]   ;;  %v4237_v4 = vld [vmem:[%s5544_s1 + $0x50] sm:$0xff]  }
   0x2   :  { %v4234_v1 = vld [vmem:[%s5544_s1] sm:$0xff]   ;;  %3358 = vmatprep.subr.bf16.mxu0 %v4233_v0  ;;  %v4236_v3 = vld [vmem:[%s5544_s1 + $0x8] sm:$0xff]   ;;  %v4238_v5 = vld [vmem:[%s5544_s1 + $0x10] sm:$0xff]  }
   0x3   :  { %3359 = vmatpush3.bf16.msra.mxu0 %v4234_v1  ;;  %v4239_v6 = vld [vmem:[%s5544_s1 + $0x58] sm:$0xff]   ;;  %v4241_v8 = vld [vmem:[%s5544_s1 + $0x60] sm:$0xff]   ;;  %v4243_v10 = vld [vmem:[%s5544_s1 + $0x68] sm:$0xff]  }
   0x4   :  { %3360 = vmatprep.subr.bf16.mxu0 %v4235_v2  ;;  %v4240_v7 = vld [vmem:[%s5544_s1 + $0x18] sm:$0xff]   ;;  %v4242_v9 = vld [vmem:[%s5544_s1 + $0x20] sm:$0xff]   ;;  %v4244_v12 = vld [vmem:[%s5544_s1 + $0x28] sm:$0xff]  }
   0x5   :  { %v4507_v11 = vld [vmem:[%s5543_s0 + $0x4] ss:$8 sps:$4 sm:$0xff]   ;;  %v4245_v13 = vld [vmem:[%s5544_s1 + $0x70] sm:$0xff]   ;;  %v4247_v15 = vld [vmem:[%s5544_s1 + $0x78] sm:$0xff]  }
   0x6   :  { %398 = vmatprep.mubr.bf16.mxu0 %v4507_v11  ;;  %v4246_v14 = vld [vmem:[%s5544_s1 + $0x30] sm:$0xff]   ;;  %v4248_v16 = vld [vmem:[%s5544_s1 + $0x38] sm:$0xff]   ;;  %v4528_v17 = vld [vmem:[%s5543_s0] ss:$8 sps:$4 sm:$0xff]  }
   0x7   :  { %3361 = vmatpush3.bf16.msra.mxu0 %v4236_v3  ;;  %v4533_v18 = vld [vmem:[%s5543_s0 + $0x14] ss:$8 sps:$4 sm:$0xff]   ;;  %v4540_v19 = vld [vmem:[%s5543_s0 + $0x10] ss:$8 sps:$4 sm:$0xff]   ;;  %v4545_v20 = vld [vmem:[%s5543_s0 + $0x24] ss:$8 sps:$4 sm:$0xff]  }
   0x8   :  { %3362 = vmatprep.subr.bf16.mxu0 %v4237_v4  ;;  %v4297_v21 = vld [vmem:[%s5545_s2] sm:$0xff]   ;;  %v4298_v22 = vld [vmem:[%s5545_s2 + $0x8] sm:$0xff]   ;;  %v4299_v23 = vld [vmem:[%s5545_s2 + $0x10] sm:$0xff]  }
   0x9   :  { %4214 = vmatprep.subr.bf16.mxu1 %v4297_v21  ;;  %v4561_v24 = vld [vmem:[%s5543_s0 + $0x20] ss:$8 sps:$4 sm:$0xff]   ;;  %v4300_v25 = vld [vmem:[%s5545_s2 + $0x18] sm:$0xff]   ;;  %v4581_v28 = vld [vmem:[%s5543_s0 + $0x44] ss:$8 sps:$4 sm:$0xff]  }
   0xa   :  { %4222 = vmatpush3.bf16.msra.mxu1 %v4297_v21  ;;  %v4569_v26 = vld [vmem:[%s5543_s0 + $0x34] ss:$8 sps:$4 sm:$0xff]   ;;  %v4576_v27 = vld [vmem:[%s5543_s0 + $0x30] ss:$8 sps:$4 sm:$0xff]   ;;  %v4588_v29 = vld [vmem:[%s5543_s0 + $0x40] ss:$8 sps:$4 sm:$0xff]  }
   0xb   :  { %3363 = vmatpush3.bf16.msra.mxu0 %v4238_v5  ;;  %4215 = vmatprep.subr.bf16.mxu1 %v4298_v22  ;;  %v4593_v30 = vld [vmem:[%s5543_s0 + $0x54] ss:$8 sps:$4 sm:$0xff]  }
   0xc   :  { %3364 = vmatprep.subr.bf16.mxu0 %v4239_v6 }
   0xe   :  { %4223 = vmatpush3.bf16.msra.mxu1 %v4298_v22 }
   0xf   :  { %3365 = vmatpush3.bf16.msra.mxu0 %v4240_v7  ;;  %4216 = vmatprep.subr.bf16.mxu1 %v4299_v23 }
  0x10   :  { %3366 = vmatprep.subr.bf16.mxu0 %v4241_v8 }
  0x12   :  { %4224 = vmatpush3.bf16.msra.mxu1 %v4299_v23 }
  0x13   :  { %3367 = vmatpush3.bf16.msra.mxu0 %v4242_v9  ;;  %4217 = vmatprep.subr.bf16.mxu1 %v4300_v25 }
  0x14   :  { %3368 = vmatprep.subr.bf16.mxu0 %v4243_v10 }
  0x16   :  { %4225 = vmatpush3.bf16.msra.mxu1 %v4300_v25 }
  0x17   :  { %3369 = vmatpush3.bf16.msra.mxu0 %v4244_v12 }
  0x18   :  { %3370 = vmatprep.subr.bf16.mxu0 %v4245_v13 }
  0x1b   :  { %3371 = vmatpush3.bf16.msra.mxu0 %v4246_v14 }
  0x1c   :  { %3372 = vmatprep.subr.bf16.mxu0 %v4247_v15 }
  0x1f   :  { %3373 = vmatpush3.bf16.msra.mxu0 %v4248_v16 }
  0x20   :  { %3974 = vmatprep.subr.bf16.mxu0 %v4297_v21 }
  0x22   :  { %399 = vmatmul.mubr.bf16.vlgmr.msra.gmra.mrb[0].mxu0 %v4528_v17 }
  0x23   :  { %406 = vmatprep.mubr.bf16.mxu0 %v4533_v18  ;;  %3975 = vmatpush3.bf16.msra.mxu0 %v4297_v21 }
  0x24   :  { %3976 = vmatprep.subr.bf16.mxu0 %v4298_v22 }
  0x27   :  { %3977 = vmatpush3.bf16.msra.mxu0 %v4298_v22 }
  0x28   :  { %3978 = vmatprep.subr.bf16.mxu0 %v4299_v23 }
  0x2a   :  { %407 = vmatmul.mubr.bf16.gmra.mrb[4].mxu0 %v4540_v19 }
  0x2b   :  { %414 = vmatprep.mubr.bf16.mxu0 %v4545_v20  ;;  %3979 = vmatpush3.bf16.msra.mxu0 %v4299_v23 }
  0x2c   :  { %3980 = vmatprep.subr.bf16.mxu0 %v4300_v25 }
  0x2f   :  { %3981 = vmatpush3.bf16.msra.mxu0 %v4300_v25 }
  0x32   :  { %415 = vmatmul.mubr.bf16.gmra.mrb[8].mxu0 %v4561_v24 }
  0x33   :  { %422 = vmatprep.mubr.bf16.mxu0 %v4569_v26 }
  0x3a   :  { %423 = vmatmul.mubr.bf16.gmra.mrb[12].mxu0 %v4576_v27 }
  0x3b   :  { %430 = vmatprep.mubr.bf16.mxu0 %v4581_v28 }
  0x3c   :  { %20 = vsyncpa [#allocation3], 0  ;;  %v4600_v31 = vld [vmem:[%s5543_s0 + $0x50] ss:$8 sps:$4 sm:$0xff]   ;;  %v4605_v32 = vld [vmem:[%s5543_s0 + $0x64] ss:$8 sps:$4 sm:$0xff]  }
  0x3d   :  { %v4612_v33 = vld [vmem:[%s5543_s0 + $0x60] ss:$8 sps:$4 sm:$0xff]   ;;  %v4617_v34 = vld [vmem:[%s5543_s0 + $0x74] ss:$8 sps:$4 sm:$0xff]   ;;  %v4624_v35 = vld [vmem:[%s5543_s0 + $0x70] ss:$8 sps:$4 sm:$0xff]  }
  0x3e   :  { %v4629_v36 = vld [vmem:[%s5543_s0 + $0x84] ss:$8 sps:$4 sm:$0xff]   ;;  %v4636_v37 = vld [vmem:[%s5543_s0 + $0x80] ss:$8 sps:$4 sm:$0xff]   ;;  %v4641_v38 = vld [vmem:[%s5543_s0 + $0x94] ss:$8 sps:$4 sm:$0xff]  }
  0x3f   :  { %v4648_v39 = vld [vmem:[%s5543_s0 + $0x90] ss:$8 sps:$4 sm:$0xff]   ;;  %v4653_v40 = vld [vmem:[%s5543_s0 + $0xa4] ss:$8 sps:$4 sm:$0xff]   ;;  %v4660_v41 = vld [vmem:[%s5543_s0 + $0xa0] ss:$8 sps:$4 sm:$0xff]  }
  0x40   :  { %v4665_v42 = vld [vmem:[%s5543_s0 + $0xb4] ss:$8 sps:$4 sm:$0xff]   ;;  %v4301_v43 = vld [vmem:[%s5545_s2 + $0x20] sm:$0xff]   ;;  %v4675_v44 = vld [vmem:[%s5543_s0 + $0xb0] ss:$8 sps:$4 sm:$0xff]  }
  0x41   :  { %3982 = vmatprep.subr.bf16.mxu0 %v4301_v43  ;;  %4218 = vmatprep.subr.bf16.mxu1 %v4301_v43  ;;  %v4680_v45 = vld [vmem:[%s5543_s0 + $0xc4] ss:$8 sps:$4 sm:$0xff]   ;;  %v4303_v47 = vld [vmem:[%s5545_s2 + $0x30] sm:$0xff]   ;;  %v4693_v48 = vld [vmem:[%s5543_s0 + $0xc0] ss:$8 sps:$4 sm:$0xff]  }
  0x42   :  { %431 = vmatmul.mubr.bf16.gmra.mrb[16].mxu0 %v4588_v29  ;;  %4226 = vmatpush3.bf16.msra.mxu1 %v4301_v43  ;;  %v4302_v46 = vld [vmem:[%s5545_s2 + $0x28] sm:$0xff]   ;;  %v4698_v49 = vld [vmem:[%s5543_s0 + $0xd4] ss:$8 sps:$4 sm:$0xff]   ;;  %v4708_v51 = vld [vmem:[%s5543_s0 + $0xd0] ss:$8 sps:$4 sm:$0xff]  }
  0x43   :  { %438 = vmatprep.mubr.bf16.mxu0 %v4593_v30  ;;  %3983 = vmatpush3.bf16.msra.mxu0 %v4301_v43  ;;  %v4304_v50 = vld [vmem:[%s5545_s2 + $0x38] sm:$0xff]   ;;  %v4713_v52 = vld [vmem:[%s5543_s0 + $0xe4] ss:$8 sps:$4 sm:$0xff]   ;;  %v4720_v53 = vld [vmem:[%s5543_s0 + $0xe0] ss:$8 sps:$4 sm:$0xff]  }
  0x44   :  { %3984 = vmatprep.subr.bf16.mxu0 %v4302_v46  ;;  %4219 = vmatprep.subr.bf16.mxu1 %v4302_v46  ;;  %v4725_v54 = vld [vmem:[%s5543_s0 + $0xf4] ss:$8 sps:$4 sm:$0xff]   ;;  %v4732_v55 = vld [vmem:[%s5543_s0 + $0xf0] ss:$8 sps:$4 sm:$0xff]  }
  0x46   :  { %4227 = vmatpush3.bf16.msra.mxu1 %v4302_v46 }
  0x47   :  { %3985 = vmatpush3.bf16.msra.mxu0 %v4302_v46  ;;  %4220 = vmatprep.subr.bf16.mxu1 %v4303_v47 }
  0x48   :  { %3986 = vmatprep.subr.bf16.mxu0 %v4303_v47 }
  0x4a   :  { %439 = vmatmul.mubr.bf16.gmra.mrb[20].mxu0 %v4600_v31  ;;  %4228 = vmatpush3.bf16.msra.mxu1 %v4303_v47 }
  0x4b   :  { %446 = vmatprep.mubr.bf16.mxu0 %v4605_v32  ;;  %3987 = vmatpush3.bf16.msra.mxu0 %v4303_v47 }
  0x4c   :  { %3988 = vmatprep.subr.bf16.mxu0 %v4304_v50  ;;  %4221 = vmatprep.subr.bf16.mxu1 %v4304_v50 }
  0x4e   :  { %4229 = vmatpush3.bf16.msra.mxu1 %v4304_v50 }
  0x4f   :  { %3989 = vmatpush3.bf16.msra.mxu0 %v4304_v50 }
  0x52   :  { %447 = vmatmul.mubr.bf16.gmra.mrb[24].mxu0 %v4612_v33 }
  0x53   :  { %454 = vmatprep.mubr.bf16.mxu0 %v4617_v34 }
  0x5a   :  { %455 = vmatmul.mubr.bf16.gmra.mrb[28].mxu0 %v4624_v35 }
  0x5b   :  { %462 = vmatprep.mubr.bf16.mxu0 %v4629_v36 }
  0x62   :  { %463 = vmatmul.mubr.bf16.gmra.mrb[32].mxu0 %v4636_v37 }
  0x63   :  { %470 = vmatprep.mubr.bf16.mxu0 %v4641_v38 }
  0x6a   :  { %471 = vmatmul.mubr.bf16.gmra.mrb[36].mxu0 %v4648_v39 }
  0x6b   :  { %478 = vmatprep.mubr.bf16.mxu0 %v4653_v40 }
  0x72   :  { %479 = vmatmul.mubr.bf16.gmra.mrb[40].mxu0 %v4660_v41 }
  0x73   :  { %486 = vmatprep.mubr.bf16.mxu0 %v4665_v42 }
  0x7a   :  { %487 = vmatmul.mubr.bf16.gmra.mrb[44].mxu0 %v4675_v44 }
  0x7b   :  { %494 = vmatprep.mubr.bf16.mxu0 %v4680_v45 }
  0x82   :  { %495 = vmatmul.mubr.bf16.gmra.mrb[48].mxu0 %v4693_v48 }
  0x83   :  { %502 = vmatprep.mubr.bf16.mxu0 %v4698_v49 }
  0x8a   :  { %503 = vmatmul.mubr.bf16.gmra.mrb[52].mxu0 %v4708_v51 }
  0x8b   :  { %510 = vmatprep.mubr.bf16.mxu0 %v4713_v52 }
  0x92   :  { %511 = vmatmul.mubr.bf16.gmra.mrb[56].mxu0 %v4720_v53 }
  0x93   :  { %518 = vmatprep.mubr.bf16.mxu0 %v4725_v54 }
  0x9a   :  { %519 = vmatmul.mubr.bf16.gmra.mrb[60].mxu0 %v4732_v55 }
  0xf5   :  { %v3374_v56 = vpop.f32.mrb[0].mxu0 }
  0xf6   :  { %v3375_v57 = vpop.f32.mrb[1].mxu0 }
  0xf7   :  { %v3376_v58 = vadd.f32 %v3375_v57, %v3374_v56  ;;  %v3377_v59 = vpop.f32.mrb[2].mxu0 }
  0xf8   :  { %v3378_v60 = vpop.f32.mrb[3].mxu0 }
  0xf9   :  { %v3379_v61 = vadd.f32 %v3378_v60, %v3377_v59 }
  0xfb   :  { %v527_v62 = vpack.c.bf16 %v3379_v61, %v3376_v58 }
  0xfd   :  { %v3380_v63 = vpop.f32.mrb[4].mxu0  ;;  %3990 = vmatprep.mubr.bf16.mxu0 %v527_v62 }
  0xfe   :  { %v3381_v0 = vpop.f32.mrb[5].mxu0 }
  0xff   :  { %v3382_v1 = vadd.f32 %v3381_v0, %v3380_v63  ;;  %v3383_v2 = vpop.f32.mrb[6].mxu0 }
 0x100   :  { %v3384_v3 = vpop.f32.mrb[7].mxu0 }
 0x101   :  { %v3385_v4 = vadd.f32 %v3384_v3, %v3383_v2 }
 0x103   :  { %v528_v5 = vpack.c.bf16 %v3385_v4, %v3382_v1 }
 0x105   :  { %v3386_v6 = vpop.f32.mrb[8].mxu0  ;;  %3991 = vmatmul.mubr.bf16.vlgmr.msra.gmra.mrb[64].mxu0 %v528_v5 }
 0x106   :  { %v3387_v7 = vpop.f32.mrb[9].mxu0 }
 0x107   :  { %v3388_v8 = vadd.f32 %v3387_v7, %v3386_v6  ;;  %v3389_v9 = vpop.f32.mrb[10].mxu0 }
 0x108   :  { %v3390_v10 = vpop.f32.mrb[11].mxu0 }
 0x109   :  { %v3391_v12 = vadd.f32 %v3390_v10, %v3389_v9 }
 0x10b   :  { %v529_v13 = vpack.c.bf16 %v3391_v12, %v3388_v8 }
 0x10d   :  { %v3392_v14 = vpop.f32.mrb[12].mxu0  ;;  %3994 = vmatprep.mubr.bf16.mxu0 %v529_v13 }
 0x10e   :  { %v3393_v15 = vpop.f32.mrb[13].mxu0 }
 0x10f   :  { %v3394_v16 = vadd.f32 %v3393_v15, %v3392_v14  ;;  %v3395_v21 = vpop.f32.mrb[14].mxu0 }
 0x110   :  { %v3396_v22 = vpop.f32.mrb[15].mxu0 }
 0x111   :  { %v3397_v23 = vadd.f32 %v3396_v22, %v3395_v21 }
 0x113   :  { %v530_v25 = vpack.c.bf16 %v3397_v23, %v3394_v16 }
 0x115   :  { %v3398_v43 = vpop.f32.mrb[16].mxu0  ;;  %3995 = vmatmul.mubr.bf16.gmra.mrb[68].mxu0 %v530_v25 }
 0x116   :  { %v3399_v46 = vpop.f32.mrb[17].mxu0 }
 0x117   :  { %v3400_v47 = vadd.f32 %v3399_v46, %v3398_v43  ;;  %v3401_v50 = vpop.f32.mrb[18].mxu0 }
 0x118   :  { %v3402_v56 = vpop.f32.mrb[19].mxu0 }
 0x119   :  { %v3403_v57 = vadd.f32 %v3402_v56, %v3401_v50 }
 0x11b   :  { %v531_v58 = vpack.c.bf16 %v3403_v57, %v3400_v47 }
 0x11d   :  { %v3404_v59 = vpop.f32.mrb[20].mxu0  ;;  %3998 = vmatprep.mubr.bf16.mxu0 %v531_v58 }
 0x11e   :  { %v3405_v60 = vpop.f32.mrb[21].mxu0 }
 0x11f   :  { %v3406_v61 = vadd.f32 %v3405_v60, %v3404_v59  ;;  %v3407_v62 = vpop.f32.mrb[22].mxu0 }
 0x120   :  { %v3408_v63 = vpop.f32.mrb[23].mxu0 }
 0x121   :  { %v3409_v0 = vadd.f32 %v3408_v63, %v3407_v62 }
 0x123   :  { %v532_v1 = vpack.c.bf16 %v3409_v0, %v3406_v61 }
 0x125   :  { %v3410_v2 = vpop.f32.mrb[24].mxu0  ;;  %3999 = vmatmul.mubr.bf16.gmra.mrb[72].mxu0 %v532_v1 }
 0x126   :  { %v3411_v3 = vpop.f32.mrb[25].mxu0 }
 0x127   :  { %v3412_v4 = vadd.f32 %v3411_v3, %v3410_v2  ;;  %v3413_v5 = vpop.f32.mrb[26].mxu0 }
 0x128   :  { %v3414_v6 = vpop.f32.mrb[27].mxu0 }
 0x129   :  { %v3415_v7 = vadd.f32 %v3414_v6, %v3413_v5 }
 0x12b   :  { %v533_v8 = vpack.c.bf16 %v3415_v7, %v3412_v4 }
 0x12d   :  { %v3416_v9 = vpop.f32.mrb[28].mxu0  ;;  %4002 = vmatprep.mubr.bf16.mxu0 %v533_v8 }
 0x12e   :  { %v3417_v10 = vpop.f32.mrb[29].mxu0 }
 0x12f   :  { %v3418_v12 = vadd.f32 %v3417_v10, %v3416_v9  ;;  %v3419_v13 = vpop.f32.mrb[30].mxu0 }
 0x130   :  { %v3420_v14 = vpop.f32.mrb[31].mxu0 }
 0x131   :  { %v3421_v15 = vadd.f32 %v3420_v14, %v3419_v13 }
 0x133   :  { %v534_v16 = vpack.c.bf16 %v3421_v15, %v3418_v12 }
 0x135   :  { %v3422_v21 = vpop.f32.mrb[32].mxu0  ;;  %4003 = vmatmul.mubr.bf16.gmra.mrb[76].mxu0 %v534_v16 }
 0x136   :  { %v3423_v22 = vpop.f32.mrb[33].mxu0 }
 0x137   :  { %v3424_v23 = vadd.f32 %v3423_v22, %v3422_v21  ;;  %v3425_v25 = vpop.f32.mrb[34].mxu0 }
 0x138   :  { %v3426_v43 = vpop.f32.mrb[35].mxu0 }
 0x139   :  { %v3427_v46 = vadd.f32 %v3426_v43, %v3425_v25 }
 0x13b   :  { %v535_v47 = vpack.c.bf16 %v3427_v46, %v3424_v23 }
 0x13d   :  { %v3428_v50 = vpop.f32.mrb[36].mxu0  ;;  %4006 = vmatprep.mubr.bf16.mxu1 %v535_v47 }
 0x13e   :  { %v3429_v56 = vpop.f32.mrb[37].mxu0 }
 0x13f   :  { %v3430_v57 = vadd.f32 %v3429_v56, %v3428_v50  ;;  %v3431_v58 = vpop.f32.mrb[38].mxu0 }
 0x140   :  { %v3432_v59 = vpop.f32.mrb[39].mxu0 }
 0x141   :  { %v3433_v60 = vadd.f32 %v3432_v59, %v3431_v58 }
 0x143   :  { %v536_v61 = vpack.c.bf16 %v3433_v60, %v3430_v57 }
 0x145   :  { %v3434_v62 = vpop.f32.mrb[40].mxu0  ;;  %4007 = vmatmul.mubr.bf16.vlgmr.msra.gmra.mrb[0].mxu1 %v536_v61 }
 0x146   :  { %v3435_v63 = vpop.f32.mrb[41].mxu0 }
 0x147   :  { %v3436_v0 = vadd.f32 %v3435_v63, %v3434_v62  ;;  %v3437_v1 = vpop.f32.mrb[42].mxu0 }
 0x148   :  { %v3438_v2 = vpop.f32.mrb[43].mxu0 }
 0x149   :  { %v3439_v3 = vadd.f32 %v3438_v2, %v3437_v1 }
 0x14b   :  { %v537_v4 = vpack.c.bf16 %v3439_v3, %v3436_v0 }
 0x14d   :  { %v3440_v5 = vpop.f32.mrb[44].mxu0  ;;  %4010 = vmatprep.mubr.bf16.mxu1 %v537_v4 }
 0x14e   :  { %v3441_v6 = vpop.f32.mrb[45].mxu0 }
 0x14f   :  { %v3442_v7 = vadd.f32 %v3441_v6, %v3440_v5  ;;  %v3443_v8 = vpop.f32.mrb[46].mxu0 }
 0x150   :  { %v3444_v9 = vpop.f32.mrb[47].mxu0 }
 0x151   :  { %v3445_v10 = vadd.f32 %v3444_v9, %v3443_v8  ;;  %v4739_v8 = vld [vmem:[%s5546_s3] ss:$0 sm:$0xff] }
 0x153   :  { %v538_v12 = vpack.c.bf16 %v3445_v10, %v3442_v7 }
 0x155   :  { %v3446_v13 = vpop.f32.mrb[48].mxu0  ;;  %4011 = vmatmul.mubr.bf16.gmra.mrb[4].mxu1 %v538_v12 }
 0x156   :  { %v3447_v14 = vpop.f32.mrb[49].mxu0 }
 0x157   :  { %v3448_v15 = vadd.f32 %v3447_v14, %v3446_v13  ;;  %v3449_v16 = vpop.f32.mrb[50].mxu0 }
 0x158   :  { %v3450_v21 = vpop.f32.mrb[51].mxu0 }
 0x159   :  { %v3451_v22 = vadd.f32 %v3450_v21, %v3449_v16 }
 0x15b   :  { %v539_v23 = vpack.c.bf16 %v3451_v22, %v3448_v15 }
 0x15d   :  { %v3452_v25 = vpop.f32.mrb[52].mxu0  ;;  %4014 = vmatprep.mubr.bf16.mxu1 %v539_v23 }
 0x15e   :  { %v3453_v43 = vpop.f32.mrb[53].mxu0 }
 0x15f   :  { %v3454_v46 = vadd.f32 %v3453_v43, %v3452_v25  ;;  %v3455_v47 = vpop.f32.mrb[54].mxu0 }
 0x160   :  { %v3456_v50 = vpop.f32.mrb[55].mxu0 }
 0x161   :  { %v3457_v56 = vadd.f32 %v3456_v50, %v3455_v47 }
 0x163   :  { %v540_v57 = vpack.c.bf16 %v3457_v56, %v3454_v46 }
 0x165   :  { %v3458_v58 = vpop.f32.mrb[56].mxu0  ;;  %4015 = vmatmul.mubr.bf16.gmra.mrb[8].mxu1 %v540_v57 }
 0x166   :  { %v3459_v59 = vpop.f32.mrb[57].mxu0 }
 0x167   :  { %v3460_v60 = vadd.f32 %v3459_v59, %v3458_v58  ;;  %v3461_v61 = vpop.f32.mrb[58].mxu0 }
 0x168   :  { %v3462_v62 = vpop.f32.mrb[59].mxu0 }
 0x169   :  { %v3463_v63 = vadd.f32 %v3462_v62, %v3461_v61 }
 0x16b   :  { %v541_v0 = vpack.c.bf16 %v3463_v63, %v3460_v60 }
 0x16d   :  { %v3464_v1 = vpop.f32.mrb[60].mxu0  ;;  %4018 = vmatprep.mubr.bf16.mxu1 %v541_v0 }
 0x16e   :  { %v3465_v2 = vpop.f32.mrb[61].mxu0 }
 0x16f   :  { %v3466_v3 = vadd.f32 %v3465_v2, %v3464_v1  ;;  %v3467_v4 = vpop.f32.mrb[62].mxu0 }
 0x170   :  { %v3468_v5 = vpop.f32.mrb[63].mxu0 }
 0x171   :  { %v3469_v6 = vadd.f32 %v3468_v5, %v3467_v4 }
 0x173   :  { %v542_v7 = vpack.c.bf16 %v3469_v6, %v3466_v3 }
 0x175   :  { %4019 = vmatmul.mubr.bf16.gmra.mrb[12].mxu1 %v542_v7 }
 0x176   :  { %855 = vmatprep.mubr.bf16.mxu1 %v4507_v11 }
 0x1d8   :  { %v3992_v9 = vpop.f32.mrb[64].mxu0 }
 0x1d9   :  { %v657_v10 = vadd.f32 %v3992_v9, %v4739_v8  ;;  %v648_v12 = vpop.f32.mrb[65].mxu0 }
 0x1da   :  { %v649_v13 = vadd.f32 %v4739_v8, %v648_v12  ;;  %v3993_v14 = vpop.f32.mrb[66].mxu0 }
 0x1db   :  { %v660_v15 = vadd.f32 %v3993_v14, %v4739_v8  ;;  %v651_v16 = vpop.f32.mrb[67].mxu0  ;;  %v777_v22 = vmax.f32 %v657_v10, 0.0 }
 0x1dc   :  { %v652_v21 = vadd.f32 %v4739_v8, %v651_v16  ;;  %v775_v11 = vmax.f32 %v649_v13, 0.0 }
 0x1dd   :  { %v778_v23 = vmax.f32 %v660_v15, 0.0 }
 0x1de   :  { %v776_v25 = vmax.f32 %v652_v21, 0.0 }
 0x1df   :  { %v808_v43 = vpack.c.bf16 %v778_v23, %v777_v22 }
 0x1e0   :  { %v807_v46 = vpack.c.bf16 %v776_v25, %v775_v11 }
 0x1e8   :  { %v3996_v47 = vpop.f32.mrb[68].mxu0 }
 0x1e9   :  { %v673_v50 = vadd.f32 %v3996_v47, %v4739_v8  ;;  %v664_v56 = vpop.f32.mrb[69].mxu0 }
 0x1ea   :  { %v665_v57 = vadd.f32 %v4739_v8, %v664_v56  ;;  %v3997_v58 = vpop.f32.mrb[70].mxu0 }
 0x1eb   :  { %v676_v59 = vadd.f32 %v3997_v58, %v4739_v8  ;;  %v667_v60 = vpop.f32.mrb[71].mxu0  ;;  %v781_v62 = vmax.f32 %v673_v50, 0.0 }
 0x1ec   :  { %v668_v61 = vadd.f32 %v4739_v8, %v667_v60  ;;  %v779_v0 = vmax.f32 %v665_v57, 0.0 }
 0x1ed   :  { %v782_v63 = vmax.f32 %v676_v59, 0.0 }
 0x1ee   :  { %v780_v1 = vmax.f32 %v668_v61, 0.0 }
 0x1ef   :  { %v4749_v2 = vpack.c.bf16 %v782_v63, %v781_v62 }
 0x1f0   :  { %v809_v3 = vpack.c.bf16 %v780_v1, %v779_v0 }
 0x1f8   :  { %v4000_v4 = vpop.f32.mrb[72].mxu0 }
 0x1f9   :  { %v689_v5 = vadd.f32 %v4000_v4, %v4739_v8  ;;  %v680_v6 = vpop.f32.mrb[73].mxu0 }
 0x1fa   :  { %v681_v7 = vadd.f32 %v4739_v8, %v680_v6  ;;  %v4001_v9 = vpop.f32.mrb[74].mxu0 }
 0x1fb   :  { %v692_v10 = vadd.f32 %v4001_v9, %v4739_v8  ;;  %v683_v12 = vpop.f32.mrb[75].mxu0  ;;  %v785_v14 = vmax.f32 %v689_v5, 0.0 }
 0x1fc   :  { %v684_v13 = vadd.f32 %v4739_v8, %v683_v12  ;;  %v783_v16 = vmax.f32 %v681_v7, 0.0 }
 0x1fd   :  { %v786_v15 = vmax.f32 %v692_v10, 0.0 }
 0x1fe   :  { %v784_v21 = vmax.f32 %v684_v13, 0.0 }
 0x1ff   :  { %v4755_v22 = vpack.c.bf16 %v786_v15, %v785_v14 }
 0x200   :  { %v4757_v23 = vpack.c.bf16 %v784_v21, %v783_v16 }
 0x208   :  { %v4004_v11 = vpop.f32.mrb[76].mxu0 }
 0x209   :  { %v705_v25 = vadd.f32 %v4004_v11, %v4739_v8  ;;  %v696_v47 = vpop.f32.mrb[77].mxu0 }
 0x20a   :  { %v697_v50 = vadd.f32 %v4739_v8, %v696_v47  ;;  %v4005_v56 = vpop.f32.mrb[78].mxu0 }
 0x20b   :  { %v708_v57 = vadd.f32 %v4005_v56, %v4739_v8  ;;  %v699_v58 = vpop.f32.mrb[79].mxu0  ;;  %v789_v60 = vmax.f32 %v705_v25, 0.0 }
 0x20c   :  { %v700_v59 = vadd.f32 %v4739_v8, %v699_v58  ;;  %v787_v62 = vmax.f32 %v697_v50, 0.0 }
 0x20d   :  { %v790_v61 = vmax.f32 %v708_v57, 0.0 }
 0x20e   :  { %v788_v63 = vmax.f32 %v700_v59, 0.0 }
 0x20f   :  { %v4763_v0 = vpack.c.bf16 %v790_v61, %v789_v60 }
 0x210   :  { %v4765_v1 = vpack.c.bf16 %v788_v63, %v787_v62 }
 0x218   :  { %v4008_v4 = vpop.f32.mrb[0].mxu1 }
 0x219   :  { %v721_v5 = vadd.f32 %v4008_v4, %v4739_v8  ;;  %v712_v6 = vpop.f32.mrb[1].mxu1 }
 0x21a   :  { %v713_v7 = vadd.f32 %v4739_v8, %v712_v6  ;;  %v4009_v9 = vpop.f32.mrb[2].mxu1 }
 0x21b   :  { %v724_v10 = vadd.f32 %v4009_v9, %v4739_v8  ;;  %v715_v12 = vpop.f32.mrb[3].mxu1  ;;  %v793_v14 = vmax.f32 %v721_v5, 0.0 }
 0x21c   :  { %v716_v13 = vadd.f32 %v4739_v8, %v715_v12  ;;  %v791_v16 = vmax.f32 %v713_v7, 0.0 }
 0x21d   :  { %v794_v15 = vmax.f32 %v724_v10, 0.0 }
 0x21e   :  { %v792_v21 = vmax.f32 %v716_v13, 0.0 }
 0x21f   :  { %v816_v11 = vpack.c.bf16 %v794_v15, %v793_v14 }
 0x220   :  { %v815_v25 = vpack.c.bf16 %v792_v21, %v791_v16 }
 0x222   :  { %3494 = vmatprep.subr.bf16.mxu1 %v815_v25 }
 0x223   :  { %3495 = vmatpush3.bf16.msra.mxu1 %v807_v46 }
 0x224   :  { %3496 = vmatprep.subr.bf16.mxu1 %v816_v11 }
 0x227   :  { %3497 = vmatpush3.bf16.msra.mxu1 %v808_v43 }
 0x228   :  { %v4012_v47 = vpop.f32.mrb[4].mxu1 }
 0x229   :  { %v737_v50 = vadd.f32 %v4012_v47, %v4739_v8  ;;  %v728_v56 = vpop.f32.mrb[5].mxu1 }
 0x22a   :  { %v729_v57 = vadd.f32 %v4739_v8, %v728_v56  ;;  %v4013_v58 = vpop.f32.mrb[6].mxu1 }
 0x22b   :  { %v740_v59 = vadd.f32 %v4013_v58, %v4739_v8  ;;  %v731_v60 = vpop.f32.mrb[7].mxu1  ;;  %v797_v62 = vmax.f32 %v737_v50, 0.0 }
 0x22c   :  { %v732_v61 = vadd.f32 %v4739_v8, %v731_v60  ;;  %v795_v4 = vmax.f32 %v729_v57, 0.0 }
 0x22d   :  { %v798_v63 = vmax.f32 %v740_v59, 0.0 }
 0x22e   :  { %v796_v5 = vmax.f32 %v732_v61, 0.0 }
 0x22f   :  { %v818_v6 = vpack.c.bf16 %v798_v63, %v797_v62 }
 0x230   :  { %v817_v46 = vpack.c.bf16 %v796_v5, %v795_v4 }
 0x232   :  { %3498 = vmatprep.subr.bf16.mxu1 %v817_v46  ;;  %v4306_v46 = vld [vmem:[%s5547_s4 + $0x8] sm:$0xff]  }
 0x233   :  { %3499 = vmatpush3.bf16.msra.mxu1 %v809_v3 }
 0x234   :  { %3500 = vmatprep.subr.bf16.mxu1 %v818_v6 }
 0x237   :  { %3501 = vmatpush3.bf16.msra.mxu1 %v4749_v2 }
 0x238   :  { %v4016_v43 = vpop.f32.mrb[8].mxu1 }
 0x239   :  { %v753_v7 = vadd.f32 %v4016_v43, %v4739_v8  ;;  %v744_v9 = vpop.f32.mrb[9].mxu1  ;;  %v4308_v43 = vld [vmem:[%s5547_s4 + $0x18] sm:$0xff]  }
 0x23a   :  { %v745_v10 = vadd.f32 %v4739_v8, %v744_v9  ;;  %v4017_v12 = vpop.f32.mrb[10].mxu1 }
 0x23b   :  { %v756_v13 = vadd.f32 %v4017_v12, %v4739_v8  ;;  %v747_v14 = vpop.f32.mrb[11].mxu1  ;;  %v801_v16 = vmax.f32 %v753_v7, 0.0 }
 0x23c   :  { %v748_v15 = vadd.f32 %v4739_v8, %v747_v14  ;;  %v799_v11 = vmax.f32 %v745_v10, 0.0 }
 0x23d   :  { %v802_v21 = vmax.f32 %v756_v13, 0.0 }
 0x23e   :  { %v800_v25 = vmax.f32 %v748_v15, 0.0 }
 0x23f   :  { %v820_v3 = vpack.c.bf16 %v802_v21, %v801_v16 }
 0x240   :  { %v819_v47 = vpack.c.bf16 %v800_v25, %v799_v11 }
 0x242   :  { %3502 = vmatprep.subr.bf16.mxu1 %v819_v47 }
 0x243   :  { %3503 = vmatpush3.bf16.msra.mxu1 %v4757_v23 }
 0x244   :  { %3504 = vmatprep.subr.bf16.mxu1 %v820_v3 }
 0x247   :  { %3505 = vmatpush3.bf16.msra.mxu1 %v4755_v22  ;;  %v4305_v22 = vld [vmem:[%s5547_s4] sm:$0xff]  }
 0x248   :  { %v4020_v2 = vpop.f32.mrb[12].mxu1  ;;  %4022 = vmatprep.subr.bf16.mxu0 %v4305_v22 }
 0x249   :  { %v769_v50 = vadd.f32 %v4020_v2, %v4739_v8  ;;  %v760_v56 = vpop.f32.mrb[13].mxu1  ;;  %4023 = vmatpush3.bf16.msra.mxu0 %v4305_v22 }
 0x24a   :  { %v761_v57 = vadd.f32 %v4739_v8, %v760_v56  ;;  %v4021_v58 = vpop.f32.mrb[14].mxu1  ;;  %4024 = vmatprep.subr.bf16.mxu0 %v4306_v46 }
 0x24b   :  { %v772_v59 = vadd.f32 %v4021_v58, %v4739_v8  ;;  %v763_v60 = vpop.f32.mrb[15].mxu1  ;;  %v805_v62 = vmax.f32 %v769_v50, 0.0 }
 0x24c   :  { %v764_v61 = vadd.f32 %v4739_v8, %v763_v60  ;;  %v803_v4 = vmax.f32 %v761_v57, 0.0  ;;  %v4307_v8 = vld [vmem:[%s5547_s4 + $0x10] sm:$0xff]  }
 0x24d   :  { %v806_v63 = vmax.f32 %v772_v59, 0.0  ;;  %4025 = vmatpush3.bf16.msra.mxu0 %v4306_v46 }
 0x24e   :  { %v804_v5 = vmax.f32 %v764_v61, 0.0  ;;  %4026 = vmatprep.subr.bf16.mxu0 %v4307_v8 }
 0x24f   :  { %v822_v23 = vpack.c.bf16 %v806_v63, %v805_v62 }
 0x250   :  { %v821_v6 = vpack.c.bf16 %v804_v5, %v803_v4 }
 0x251   :  { %4027 = vmatpush3.bf16.msra.mxu0 %v4307_v8 }
 0x252   :  { %3506 = vmatprep.subr.bf16.mxu1 %v821_v6  ;;  %4028 = vmatprep.subr.bf16.mxu0 %v4308_v43 }
 0x253   :  { %3507 = vmatpush3.bf16.msra.mxu1 %v4765_v1 }
 0x254   :  { %3508 = vmatprep.subr.bf16.mxu1 %v822_v23 }
 0x255   :  { %4029 = vmatpush3.bf16.msra.mxu0 %v4308_v43 }
 0x257   :  { %3509 = vmatpush3.bf16.msra.mxu1 %v4763_v0 }
 0x25a   :  { %856 = vmatmul.mubr.bf16.vlgmr.msra.gmra.mrb[16].mxu1 %v4528_v17  ;;  %v4309_v17 = vld [vmem:[%s5547_s4 + $0x20] sm:$0xff]  }
 0x25b   :  { %863 = vmatprep.mubr.bf16.mxu1 %v4533_v18  ;;  %4030 = vmatprep.subr.bf16.mxu0 %v4309_v17  ;;  %v4310_v18 = vld [vmem:[%s5547_s4 + $0x28] sm:$0xff]  }
 0x25c   :  { %4031 = vmatpush3.bf16.msra.mxu0 %v4309_v17 }
 0x25d   :  { %4032 = vmatprep.subr.bf16.mxu0 %v4310_v18 }
 0x260   :  { %4033 = vmatpush3.bf16.msra.mxu0 %v4310_v18 }
 0x262   :  { %864 = vmatmul.mubr.bf16.gmra.mrb[20].mxu1 %v4540_v19  ;;  %v4311_v19 = vld [vmem:[%s5547_s4 + $0x30] sm:$0xff]  }
 0x263   :  { %871 = vmatprep.mubr.bf16.mxu1 %v4545_v20  ;;  %4034 = vmatprep.subr.bf16.mxu0 %v4311_v19  ;;  %v4312_v20 = vld [vmem:[%s5547_s4 + $0x38] sm:$0xff]  }
 0x264   :  { %4035 = vmatpush3.bf16.msra.mxu0 %v4311_v19 }
 0x265   :  { %4036 = vmatprep.subr.bf16.mxu0 %v4312_v20 }
 0x268   :  { %4037 = vmatpush3.bf16.msra.mxu0 %v4312_v20 }
 0x26a   :  { %872 = vmatmul.mubr.bf16.gmra.mrb[24].mxu1 %v4561_v24 }
 0x26b   :  { %879 = vmatprep.mubr.bf16.mxu1 %v4569_v26 }
 0x272   :  { %880 = vmatmul.mubr.bf16.gmra.mrb[28].mxu1 %v4576_v27 }
 0x273   :  { %887 = vmatprep.mubr.bf16.mxu1 %v4581_v28 }
 0x27a   :  { %888 = vmatmul.mubr.bf16.gmra.mrb[32].mxu1 %v4588_v29 }
 0x27b   :  { %895 = vmatprep.mubr.bf16.mxu1 %v4593_v30 }
 0x282   :  { %896 = vmatmul.mubr.bf16.gmra.mrb[36].mxu1 %v4600_v31 }
 0x283   :  { %903 = vmatprep.mubr.bf16.mxu1 %v4605_v32 }
 0x28a   :  { %904 = vmatmul.mubr.bf16.gmra.mrb[40].mxu1 %v4612_v33 }
 0x28b   :  { %911 = vmatprep.mubr.bf16.mxu1 %v4617_v34 }
 0x292   :  { %912 = vmatmul.mubr.bf16.gmra.mrb[44].mxu1 %v4624_v35 }
 0x293   :  { %919 = vmatprep.mubr.bf16.mxu1 %v4629_v36 }
 0x29a   :  { %920 = vmatmul.mubr.bf16.gmra.mrb[48].mxu1 %v4636_v37 }
 0x29b   :  { %927 = vmatprep.mubr.bf16.mxu1 %v4641_v38 }
 0x2a2   :  { %928 = vmatmul.mubr.bf16.gmra.mrb[52].mxu1 %v4648_v39 }
 0x2a3   :  { %935 = vmatprep.mubr.bf16.mxu1 %v4653_v40 }
 0x2aa   :  { %936 = vmatmul.mubr.bf16.gmra.mrb[56].mxu1 %v4660_v41 }
 0x2ab   :  { %943 = vmatprep.mubr.bf16.mxu1 %v4665_v42 }
 0x2b2   :  { %944 = vmatmul.mubr.bf16.gmra.mrb[60].mxu1 %v4675_v44 }
 0x2b3   :  { %951 = vmatprep.mubr.bf16.mxu1 %v4680_v45 }
 0x2ba   :  { %952 = vmatmul.mubr.bf16.gmra.mrb[64].mxu1 %v4693_v48 }
 0x2bb   :  { %959 = vmatprep.mubr.bf16.mxu1 %v4698_v49 }
 0x2c2   :  { %960 = vmatmul.mubr.bf16.gmra.mrb[68].mxu1 %v4708_v51 }
 0x2c3   :  { %967 = vmatprep.mubr.bf16.mxu1 %v4713_v52 }
 0x2ca   :  { %968 = vmatmul.mubr.bf16.gmra.mrb[72].mxu1 %v4720_v53 }
 0x2cb   :  { %975 = vmatprep.mubr.bf16.mxu1 %v4725_v54 }
 0x2d2   :  { %976 = vmatmul.mubr.bf16.gmra.mrb[76].mxu1 %v4732_v55 }
 0x32d   :  { %v3510_v24 = vpop.f32.mrb[16].mxu1 }
 0x32e   :  { %v3511_v26 = vpop.f32.mrb[17].mxu1 }
 0x32f   :  { %v3512_v27 = vadd.f32 %v3511_v26, %v3510_v24  ;;  %v3513_v28 = vpop.f32.mrb[18].mxu1 }
 0x330   :  { %v3514_v29 = vpop.f32.mrb[19].mxu1 }
 0x331   :  { %v3515_v30 = vadd.f32 %v3514_v29, %v3513_v28 }
 0x333   :  { %v984_v31 = vpack.c.bf16 %v3515_v30, %v3512_v27 }
 0x335   :  { %v3516_v32 = vpop.f32.mrb[20].mxu1  ;;  %4038 = vmatprep.mubr.bf16.mxu0 %v984_v31 }
 0x336   :  { %v3517_v33 = vpop.f32.mrb[21].mxu1 }
 0x337   :  { %v3518_v34 = vadd.f32 %v3517_v33, %v3516_v32  ;;  %v3519_v35 = vpop.f32.mrb[22].mxu1 }
 0x338   :  { %v3520_v36 = vpop.f32.mrb[23].mxu1 }
 0x339   :  { %v3521_v37 = vadd.f32 %v3520_v36, %v3519_v35 }
 0x33b   :  { %v985_v38 = vpack.c.bf16 %v3521_v37, %v3518_v34 }
 0x33d   :  { %v3522_v39 = vpop.f32.mrb[24].mxu1  ;;  %4039 = vmatmul.mubr.bf16.vlgmr.msra.gmra.mrb[80].mxu0 %v985_v38 }
 0x33e   :  { %v3523_v40 = vpop.f32.mrb[25].mxu1 }
 0x33f   :  { %v3524_v41 = vadd.f32 %v3523_v40, %v3522_v39  ;;  %v3525_v42 = vpop.f32.mrb[26].mxu1 }
 0x340   :  { %v3526_v44 = vpop.f32.mrb[27].mxu1 }
 0x341   :  { %v3527_v45 = vadd.f32 %v3526_v44, %v3525_v42 }
 0x343   :  { %v986_v48 = vpack.c.bf16 %v3527_v45, %v3524_v41 }
 0x345   :  { %v3528_v49 = vpop.f32.mrb[28].mxu1  ;;  %4042 = vmatprep.mubr.bf16.mxu0 %v986_v48 }
 0x346   :  { %v3529_v51 = vpop.f32.mrb[29].mxu1 }
 0x347   :  { %v3530_v52 = vadd.f32 %v3529_v51, %v3528_v49  ;;  %v3531_v53 = vpop.f32.mrb[30].mxu1 }
 0x348   :  { %v3532_v54 = vpop.f32.mrb[31].mxu1 }
 0x349   :  { %v3533_v55 = vadd.f32 %v3532_v54, %v3531_v53 }
 0x34b   :  { %v987_v0 = vpack.c.bf16 %v3533_v55, %v3530_v52 }
 0x34d   :  { %v3534_v1 = vpop.f32.mrb[32].mxu1  ;;  %4043 = vmatmul.mubr.bf16.gmra.mrb[84].mxu0 %v987_v0 }
 0x34e   :  { %v3535_v7 = vpop.f32.mrb[33].mxu1 }
 0x34f   :  { %v3536_v9 = vadd.f32 %v3535_v7, %v3534_v1  ;;  %v3537_v10 = vpop.f32.mrb[34].mxu1 }
 0x350   :  { %v3538_v12 = vpop.f32.mrb[35].mxu1 }
 0x351   :  { %v3539_v13 = vadd.f32 %v3538_v12, %v3537_v10 }
 0x353   :  { %v988_v14 = vpack.c.bf16 %v3539_v13, %v3536_v9 }
 0x355   :  { %v3540_v15 = vpop.f32.mrb[36].mxu1  ;;  %4046 = vmatprep.mubr.bf16.mxu0 %v988_v14 }
 0x356   :  { %v3541_v16 = vpop.f32.mrb[37].mxu1 }
 0x357   :  { %v3542_v21 = vadd.f32 %v3541_v16, %v3540_v15  ;;  %v3543_v11 = vpop.f32.mrb[38].mxu1 }
 0x358   :  { %v3544_v25 = vpop.f32.mrb[39].mxu1 }
 0x359   :  { %v3545_v3 = vadd.f32 %v3544_v25, %v3543_v11 }
 0x35b   :  { %v989_v47 = vpack.c.bf16 %v3545_v3, %v3542_v21 }
 0x35d   :  { %v3546_v2 = vpop.f32.mrb[40].mxu1  ;;  %4047 = vmatmul.mubr.bf16.gmra.mrb[88].mxu0 %v989_v47 }
 0x35e   :  { %v3547_v50 = vpop.f32.mrb[41].mxu1 }
 0x35f   :  { %v3548_v56 = vadd.f32 %v3547_v50, %v3546_v2  ;;  %v3549_v57 = vpop.f32.mrb[42].mxu1 }
 0x360   :  { %v3550_v58 = vpop.f32.mrb[43].mxu1 }
 0x361   :  { %v3551_v59 = vadd.f32 %v3550_v58, %v3549_v57 }
 0x363   :  { %v990_v60 = vpack.c.bf16 %v3551_v59, %v3548_v56 }
 0x365   :  { %v3552_v61 = vpop.f32.mrb[44].mxu1  ;;  %4050 = vmatprep.mubr.bf16.mxu0 %v990_v60  ;;  %v4846_v60 = vld [vmem:[%s5543_s0 + $0x4] ss:$8 sps:$4 sm:$0xff]  }
 0x366   :  { %v3553_v62 = vpop.f32.mrb[45].mxu1 }
 0x367   :  { %v3554_v63 = vadd.f32 %v3553_v62, %v3552_v61  ;;  %v3555_v4 = vpop.f32.mrb[46].mxu1  ;;  %v4852_v62 = vld [vmem:[%s5548_s5] ss:$0 sm:$0xff] }
 0x368   :  { %v3556_v5 = vpop.f32.mrb[47].mxu1 }
 0x369   :  { %v3557_v23 = vadd.f32 %v3556_v5, %v3555_v4 }
 0x36b   :  { %v991_v6 = vpack.c.bf16 %v3557_v23, %v3554_v63 }
 0x36d   :  { %v3558_v22 = vpop.f32.mrb[48].mxu1  ;;  %4051 = vmatmul.mubr.bf16.gmra.mrb[92].mxu0 %v991_v6 }
 0x36e   :  { %v3559_v46 = vpop.f32.mrb[49].mxu1 }
 0x36f   :  { %v3560_v8 = vadd.f32 %v3559_v46, %v3558_v22  ;;  %v3561_v43 = vpop.f32.mrb[50].mxu1 }
 0x370   :  { %v3562_v17 = vpop.f32.mrb[51].mxu1 }
 0x371   :  { %v3563_v18 = vadd.f32 %v3562_v17, %v3561_v43 }
 0x373   :  { %v992_v19 = vpack.c.bf16 %v3563_v18, %v3560_v8 }
 0x375   :  { %v3564_v20 = vpop.f32.mrb[52].mxu1  ;;  %4054 = vmatprep.mubr.bf16.mxu0 %v992_v19 }
 0x376   :  { %v3565_v24 = vpop.f32.mrb[53].mxu1 }
 0x377   :  { %v3566_v26 = vadd.f32 %v3565_v24, %v3564_v20  ;;  %v3567_v27 = vpop.f32.mrb[54].mxu1 }
 0x378   :  { %v3568_v28 = vpop.f32.mrb[55].mxu1 }
 0x379   :  { %v3569_v29 = vadd.f32 %v3568_v28, %v3567_v27 }
 0x37b   :  { %v993_v30 = vpack.c.bf16 %v3569_v29, %v3566_v26 }
 0x37d   :  { %v3570_v31 = vpop.f32.mrb[56].mxu1  ;;  %4055 = vmatmul.mubr.bf16.gmra.mrb[96].mxu0 %v993_v30 }
 0x37e   :  { %v3571_v32 = vpop.f32.mrb[57].mxu1 }
 0x37f   :  { %v3572_v33 = vadd.f32 %v3571_v32, %v3570_v31  ;;  %v3573_v34 = vpop.f32.mrb[58].mxu1 }
 0x380   :  { %v3574_v35 = vpop.f32.mrb[59].mxu1 }
 0x381   :  { %v3575_v36 = vadd.f32 %v3574_v35, %v3573_v34 }
 0x383   :  { %v994_v37 = vpack.c.bf16 %v3575_v36, %v3572_v33 }
 0x385   :  { %v3576_v38 = vpop.f32.mrb[60].mxu1  ;;  %4058 = vmatprep.mubr.bf16.mxu0 %v994_v37 }
 0x386   :  { %v3577_v39 = vpop.f32.mrb[61].mxu1 }
 0x387   :  { %v3578_v40 = vadd.f32 %v3577_v39, %v3576_v38  ;;  %v3579_v41 = vpop.f32.mrb[62].mxu1 }
 0x388   :  { %v3580_v42 = vpop.f32.mrb[63].mxu1 }
 0x389   :  { %v3581_v44 = vadd.f32 %v3580_v42, %v3579_v41 }
 0x38b   :  { %v995_v45 = vpack.c.bf16 %v3581_v44, %v3578_v40 }
 0x38d   :  { %v3582_v48 = vpop.f32.mrb[64].mxu1  ;;  %4059 = vmatmul.mubr.bf16.gmra.mrb[100].mxu0 %v995_v45 }
 0x38e   :  { %v3583_v49 = vpop.f32.mrb[65].mxu1 }
 0x38f   :  { %v3584_v51 = vadd.f32 %v3583_v49, %v3582_v48  ;;  %v3585_v52 = vpop.f32.mrb[66].mxu1 }
 0x390   :  { %v3586_v53 = vpop.f32.mrb[67].mxu1 }
 0x391   :  { %v3587_v54 = vadd.f32 %v3586_v53, %v3585_v52 }
 0x393   :  { %v996_v55 = vpack.c.bf16 %v3587_v54, %v3584_v51 }
 0x395   :  { %v3588_v0 = vpop.f32.mrb[68].mxu1  ;;  %4062 = vmatprep.mubr.bf16.mxu0 %v996_v55 }
 0x396   :  { %v3589_v1 = vpop.f32.mrb[69].mxu1 }
 0x397   :  { %v3590_v7 = vadd.f32 %v3589_v1, %v3588_v0  ;;  %v3591_v9 = vpop.f32.mrb[70].mxu1 }
 0x398   :  { %v3592_v10 = vpop.f32.mrb[71].mxu1 }
 0x399   :  { %v3593_v12 = vadd.f32 %v3592_v10, %v3591_v9 }
 0x39b   :  { %v997_v13 = vpack.c.bf16 %v3593_v12, %v3590_v7 }
 0x39d   :  { %v3594_v14 = vpop.f32.mrb[72].mxu1  ;;  %4063 = vmatmul.mubr.bf16.gmra.mrb[104].mxu0 %v997_v13 }
 0x39e   :  { %v3595_v15 = vpop.f32.mrb[73].mxu1 }
 0x39f   :  { %v3596_v16 = vadd.f32 %v3595_v15, %v3594_v14  ;;  %v3597_v21 = vpop.f32.mrb[74].mxu1 }
 0x3a0   :  { %v3598_v11 = vpop.f32.mrb[75].mxu1 }
 0x3a1   :  { %v3599_v25 = vadd.f32 %v3598_v11, %v3597_v21 }
 0x3a3   :  { %v998_v3 = vpack.c.bf16 %v3599_v25, %v3596_v16 }
 0x3a5   :  { %v3600_v47 = vpop.f32.mrb[76].mxu1  ;;  %4066 = vmatprep.mubr.bf16.mxu0 %v998_v3 }
 0x3a6   :  { %v3601_v2 = vpop.f32.mrb[77].mxu1 }
 0x3a7   :  { %v3602_v50 = vadd.f32 %v3601_v2, %v3600_v47  ;;  %v3603_v56 = vpop.f32.mrb[78].mxu1 }
 0x3a8   :  { %v3604_v57 = vpop.f32.mrb[79].mxu1 }
 0x3a9   :  { %v3605_v58 = vadd.f32 %v3604_v57, %v3603_v56 }
 0x3ab   :  { %v999_v59 = vpack.c.bf16 %v3605_v58, %v3602_v50 }
 0x3ad   :  { %4067 = vmatmul.mubr.bf16.gmra.mrb[108].mxu0 %v999_v59 }
 0x3ae   :  { %1280 = vmatprep.mubr.bf16.mxu0 %v4846_v60 }
 0x410   :  { %v4040_v61 = vpop.f32.mrb[80].mxu0 }
 0x411   :  { %v1105_v63 = vpop.f32.mrb[81].mxu0  ;;  %v1114_v5 = vadd.f32 %v4040_v61, %v4852_v62 }
 0x412   :  { %v4041_v4 = vpop.f32.mrb[82].mxu0  ;;  %v1106_v22 = vadd.f32 %v4852_v62, %v1105_v63 }
 0x413   :  { %v1117_v23 = vadd.f32 %v4041_v4, %v4852_v62  ;;  %v1108_v6 = vpop.f32.mrb[83].mxu0 }
 0x414   :  { %v1109_v46 = vadd.f32 %v4852_v62, %v1108_v6 }
 0x415   :  { %v1233_v8 = vpack.c.bf16 %v1117_v23, %v1114_v5 }
 0x416   :  { %v1232_v43 = vpack.c.bf16 %v1109_v46, %v1106_v22 }
 0x417   :  { %3328 = vst [vmem:[%s5557_s14 + $0x8] sm:$0xff] %v1233_v8  }
 0x418   :  { %3172 = vst [vmem:[%s5557_s14] sm:$0xff] %v1232_v43  }
 0x420   :  { %v4044_v17 = vpop.f32.mrb[84].mxu0 }
 0x421   :  { %v1121_v18 = vpop.f32.mrb[85].mxu0  ;;  %v1130_v20 = vadd.f32 %v4044_v17, %v4852_v62 }
 0x422   :  { %v4045_v19 = vpop.f32.mrb[86].mxu0  ;;  %v1122_v27 = vadd.f32 %v4852_v62, %v1121_v18 }
 0x423   :  { %v1133_v24 = vadd.f32 %v4045_v19, %v4852_v62  ;;  %v1124_v26 = vpop.f32.mrb[87].mxu0 }
 0x424   :  { %v1125_v28 = vadd.f32 %v4852_v62, %v1124_v26 }
 0x425   :  { %v1235_v29 = vpack.c.bf16 %v1133_v24, %v1130_v20 }
 0x426   :  { %v1234_v30 = vpack.c.bf16 %v1125_v28, %v1122_v27 }
 0x427   :  { %3330 = vst [vmem:[%s5557_s14 + $0x18] sm:$0xff] %v1235_v29  }
 0x428   :  { %3329 = vst [vmem:[%s5557_s14 + $0x10] sm:$0xff] %v1234_v30  }
 0x430   :  { %v4048_v31 = vpop.f32.mrb[88].mxu0 }
 0x431   :  { %v1137_v32 = vpop.f32.mrb[89].mxu0  ;;  %v1146_v34 = vadd.f32 %v4048_v31, %v4852_v62  ;;  %v4954_v31 = vld [vmem:[%s5543_s0] ss:$8 sps:$4 sm:$0xff]  }
 0x432   :  { %v4049_v33 = vpop.f32.mrb[90].mxu0  ;;  %v1138_v37 = vadd.f32 %v4852_v62, %v1137_v32  ;;  %v4316_v32 = vld [vmem:[%s5549_s6 + $0x18] sm:$0xff]  }
 0x433   :  { %v1149_v35 = vadd.f32 %v4049_v33, %v4852_v62  ;;  %v1140_v36 = vpop.f32.mrb[91].mxu0  ;;  %v4963_v33 = vld [vmem:[%s5543_s0 + $0x14] ss:$8 sps:$4 sm:$0xff]  }
 0x434   :  { %v1141_v38 = vadd.f32 %v4852_v62, %v1140_v36  ;;  %v4981_v36 = vld [vmem:[%s5543_s0 + $0x20] ss:$8 sps:$4 sm:$0xff]  }
 0x435   :  { %v1237_v39 = vpack.c.bf16 %v1149_v35, %v1146_v34  ;;  %v4969_v34 = vld [vmem:[%s5543_s0 + $0x10] ss:$8 sps:$4 sm:$0xff]   ;;  %v4975_v35 = vld [vmem:[%s5543_s0 + $0x24] ss:$8 sps:$4 sm:$0xff]  }
 0x436   :  { %v1236_v40 = vpack.c.bf16 %v1141_v38, %v1138_v37  ;;  %v4987_v37 = vld [vmem:[%s5543_s0 + $0x34] ss:$8 sps:$4 sm:$0xff]   ;;  %v4993_v38 = vld [vmem:[%s5543_s0 + $0x30] ss:$8 sps:$4 sm:$0xff]  }
 0x437   :  { %3332 = vst [vmem:[%s5557_s14 + $0x28] sm:$0xff] %v1237_v39  }
 0x438   :  { %3331 = vst [vmem:[%s5557_s14 + $0x20] sm:$0xff] %v1236_v40  }
 0x440   :  { %v4052_v41 = vpop.f32.mrb[92].mxu0 }
 0x441   :  { %v1153_v42 = vpop.f32.mrb[93].mxu0  ;;  %v1162_v45 = vadd.f32 %v4052_v41, %v4852_v62  ;;  %v5011_v41 = vld [vmem:[%s5543_s0 + $0x54] ss:$8 sps:$4 sm:$0xff]  }
 0x442   :  { %v4053_v44 = vpop.f32.mrb[94].mxu0  ;;  %v1154_v51 = vadd.f32 %v4852_v62, %v1153_v42  ;;  %v5017_v42 = vld [vmem:[%s5543_s0 + $0x50] ss:$8 sps:$4 sm:$0xff]  }
 0x443   :  { %v1165_v48 = vadd.f32 %v4053_v44, %v4852_v62  ;;  %v1156_v49 = vpop.f32.mrb[95].mxu0  ;;  %v5023_v44 = vld [vmem:[%s5543_s0 + $0x64] ss:$8 sps:$4 sm:$0xff]  }
 0x444   :  { %v1157_v52 = vadd.f32 %v4852_v62, %v1156_v49  ;;  %v5041_v49 = vld [vmem:[%s5543_s0 + $0x70] ss:$8 sps:$4 sm:$0xff]  }
 0x445   :  { %v4888_v53 = vpack.c.bf16 %v1165_v48, %v1162_v45  ;;  %v5029_v45 = vld [vmem:[%s5543_s0 + $0x60] ss:$8 sps:$4 sm:$0xff]   ;;  %v5035_v48 = vld [vmem:[%s5543_s0 + $0x74] ss:$8 sps:$4 sm:$0xff]  }
 0x446   :  { %v4890_v54 = vpack.c.bf16 %v1157_v52, %v1154_v51  ;;  %v5047_v51 = vld [vmem:[%s5543_s0 + $0x84] ss:$8 sps:$4 sm:$0xff]   ;;  %v5053_v52 = vld [vmem:[%s5543_s0 + $0x80] ss:$8 sps:$4 sm:$0xff]  }
 0x447   :  { %3334 = vst [vmem:[%s5557_s14 + $0x38] sm:$0xff] %v4888_v53  }
 0x448   :  { %3333 = vst [vmem:[%s5557_s14 + $0x30] sm:$0xff] %v4890_v54  }
 0x450   :  { %v4056_v55 = vpop.f32.mrb[96].mxu0 }
 0x451   :  { %v1169_v0 = vpop.f32.mrb[97].mxu0  ;;  %v1178_v7 = vadd.f32 %v4056_v55, %v4852_v62  ;;  %v5071_v55 = vld [vmem:[%s5543_s0 + $0xa4] ss:$8 sps:$4 sm:$0xff]  }
 0x452   :  { %v4057_v1 = vpop.f32.mrb[98].mxu0  ;;  %v1170_v12 = vadd.f32 %v4852_v62, %v1169_v0  ;;  %v5077_v0 = vld [vmem:[%s5543_s0 + $0xa0] ss:$8 sps:$4 sm:$0xff]  }
 0x453   :  { %v1181_v9 = vadd.f32 %v4057_v1, %v4852_v62  ;;  %v1172_v10 = vpop.f32.mrb[99].mxu0  ;;  %v5083_v1 = vld [vmem:[%s5543_s0 + $0xb4] ss:$8 sps:$4 sm:$0xff]  }
 0x454   :  { %v1173_v13 = vadd.f32 %v4852_v62, %v1172_v10  ;;  %v5095_v10 = vld [vmem:[%s5543_s0 + $0xb0] ss:$8 sps:$4 sm:$0xff]  }
 0x455   :  { %v1241_v14 = vpack.c.bf16 %v1181_v9, %v1178_v7  ;;  %v4317_v7 = vld [vmem:[%s5549_s6 + $0x20] sm:$0xff]   ;;  %v4318_v9 = vld [vmem:[%s5549_s6 + $0x28] sm:$0xff]  }
 0x456   :  { %v1240_v15 = vpack.c.bf16 %v1173_v13, %v1170_v12  ;;  %v5101_v12 = vld [vmem:[%s5543_s0 + $0xc4] ss:$8 sps:$4 sm:$0xff]   ;;  %v4319_v13 = vld [vmem:[%s5549_s6 + $0x30] sm:$0xff]  }
 0x457   :  { %3336 = vst [vmem:[%s5557_s14 + $0x48] sm:$0xff] %v1241_v14  }
 0x458   :  { %3335 = vst [vmem:[%s5557_s14 + $0x40] sm:$0xff] %v1240_v15   ;;  %3630 = vmatprep.subr.bf16.mxu0 %v1240_v15  ;;  %v5113_v15 = vld [vmem:[%s5543_s0 + $0xc0] ss:$8 sps:$4 sm:$0xff]  }
 0x459   :  { %3631 = vmatpush3.bf16.msra.mxu0 %v1232_v43 }
 0x45a   :  { %3632 = vmatprep.subr.bf16.mxu0 %v1241_v14  ;;  %v4320_v14 = vld [vmem:[%s5549_s6 + $0x38] sm:$0xff]  }
 0x45d   :  { %3633 = vmatpush3.bf16.msra.mxu0 %v1233_v8 }
 0x460   :  { %v4060_v16 = vpop.f32.mrb[100].mxu0 }
 0x461   :  { %v1185_v21 = vpop.f32.mrb[101].mxu0  ;;  %v1194_v25 = vadd.f32 %v4060_v16, %v4852_v62  ;;  %v5119_v16 = vld [vmem:[%s5543_s0 + $0xd4] ss:$8 sps:$4 sm:$0xff]  }
 0x462   :  { %v4061_v11 = vpop.f32.mrb[102].mxu0  ;;  %v1186_v2 = vadd.f32 %v4852_v62, %v1185_v21  ;;  %v5125_v21 = vld [vmem:[%s5543_s0 + $0xd0] ss:$8 sps:$4 sm:$0xff]  }
 0x463   :  { %v1197_v3 = vadd.f32 %v4061_v11, %v4852_v62  ;;  %v1188_v47 = vpop.f32.mrb[103].mxu0  ;;  %v5131_v11 = vld [vmem:[%s5543_s0 + $0xe4] ss:$8 sps:$4 sm:$0xff]  }
 0x464   :  { %v1189_v50 = vadd.f32 %v4852_v62, %v1188_v47  ;;  %v5149_v47 = vld [vmem:[%s5543_s0 + $0xf0] ss:$8 sps:$4 sm:$0xff]  }
 0x465   :  { %v1243_v56 = vpack.c.bf16 %v1197_v3, %v1194_v25  ;;  %v5137_v25 = vld [vmem:[%s5543_s0 + $0xe0] ss:$8 sps:$4 sm:$0xff]   ;;  %v5143_v3 = vld [vmem:[%s5543_s0 + $0xf4] ss:$8 sps:$4 sm:$0xff]  }
 0x466   :  { %v1242_v57 = vpack.c.bf16 %v1189_v50, %v1186_v2  ;;  %v4321_v2 = vld [vmem:[%s5553_s10] sm:$0xff]  }
 0x467   :  { %3338 = vst [vmem:[%s5557_s14 + $0x58] sm:$0xff] %v1243_v56  }
 0x468   :  { %3337 = vst [vmem:[%s5557_s14 + $0x50] sm:$0xff] %v1242_v57   ;;  %3634 = vmatprep.subr.bf16.mxu0 %v1242_v57 }
 0x469   :  { %3635 = vmatpush3.bf16.msra.mxu0 %v1234_v30  ;;  %v4314_v30 = vld [vmem:[%s5549_s6 + $0x8] sm:$0xff]  }
 0x46a   :  { %3636 = vmatprep.subr.bf16.mxu0 %v1243_v56 }
 0x46d   :  { %3637 = vmatpush3.bf16.msra.mxu0 %v1235_v29  ;;  %v4313_v29 = vld [vmem:[%s5549_s6] sm:$0xff]  }
 0x46e   :  { %4070 = vmatprep.subr.bf16.mxu1 %v4313_v29 }
 0x46f   :  { %4071 = vmatpush3.bf16.msra.mxu1 %v4313_v29 }
 0x470   :  { %v4064_v58 = vpop.f32.mrb[104].mxu0  ;;  %4072 = vmatprep.subr.bf16.mxu1 %v4314_v30 }
 0x471   :  { %v1201_v59 = vpop.f32.mrb[105].mxu0  ;;  %v1210_v63 = vadd.f32 %v4064_v58, %v4852_v62 }
 0x472   :  { %v4065_v61 = vpop.f32.mrb[106].mxu0  ;;  %v1202_v23 = vadd.f32 %v4852_v62, %v1201_v59 }
 0x473   :  { %v1213_v4 = vadd.f32 %v4065_v61, %v4852_v62  ;;  %v1204_v5 = vpop.f32.mrb[107].mxu0  ;;  %4073 = vmatpush3.bf16.msra.mxu1 %v4314_v30 }
 0x474   :  { %v1205_v6 = vadd.f32 %v4852_v62, %v1204_v5 }
 0x475   :  { %v1245_v22 = vpack.c.bf16 %v1213_v4, %v1210_v63 }
 0x476   :  { %v1244_v46 = vpack.c.bf16 %v1205_v6, %v1202_v23 }
 0x477   :  { %3340 = vst [vmem:[%s5557_s14 + $0x68] sm:$0xff] %v1245_v22  }
 0x478   :  { %3339 = vst [vmem:[%s5557_s14 + $0x60] sm:$0xff] %v1244_v46   ;;  %3638 = vmatprep.subr.bf16.mxu0 %v1244_v46 }
 0x479   :  { %3639 = vmatpush3.bf16.msra.mxu0 %v1236_v40  ;;  %v5005_v40 = vld [vmem:[%s5543_s0 + $0x40] ss:$8 sps:$4 sm:$0xff]  }
 0x47a   :  { %3640 = vmatprep.subr.bf16.mxu0 %v1245_v22 }
 0x47d   :  { %3641 = vmatpush3.bf16.msra.mxu0 %v1237_v39  ;;  %v4999_v39 = vld [vmem:[%s5543_s0 + $0x44] ss:$8 sps:$4 sm:$0xff]  }
 0x480   :  { %v4068_v8 = vpop.f32.mrb[108].mxu0 }
 0x481   :  { %v1217_v43 = vpop.f32.mrb[109].mxu0  ;;  %v1226_v18 = vadd.f32 %v4068_v8, %v4852_v62  ;;  %v4322_v8 = vld [vmem:[%s5553_s10 + $0x8] sm:$0xff]  }
 0x482   :  { %v4069_v17 = vpop.f32.mrb[110].mxu0  ;;  %v1218_v24 = vadd.f32 %v4852_v62, %v1217_v43 }
 0x483   :  { %v1229_v19 = vadd.f32 %v4069_v17, %v4852_v62  ;;  %v1220_v20 = vpop.f32.mrb[111].mxu0 }
 0x484   :  { %v1221_v26 = vadd.f32 %v4852_v62, %v1220_v20  ;;  %v4315_v62 = vld [vmem:[%s5549_s6 + $0x10] sm:$0xff]  }
 0x485   :  { %v1247_v27 = vpack.c.bf16 %v1229_v19, %v1226_v18  ;;  %4074 = vmatprep.subr.bf16.mxu1 %v4315_v62  ;;  %v4323_v20 = vld [vmem:[%s5553_s10 + $0x10] sm:$0xff]  }
 0x486   :  { %v1246_v28 = vpack.c.bf16 %v1221_v26, %v1218_v24  ;;  %4075 = vmatpush3.bf16.msra.mxu1 %v4315_v62 }
 0x487   :  { %3342 = vst [vmem:[%s5557_s14 + $0x78] sm:$0xff] %v1247_v27   ;;  %4076 = vmatprep.subr.bf16.mxu1 %v4316_v32 }
 0x488   :  { %3341 = vst [vmem:[%s5557_s14 + $0x70] sm:$0xff] %v1246_v28   ;;  %3642 = vmatprep.subr.bf16.mxu0 %v1246_v28  ;;  %v4324_v28 = vld [vmem:[%s5553_s10 + $0x18] sm:$0xff]  }
 0x489   :  { %3643 = vmatpush3.bf16.msra.mxu0 %v4890_v54  ;;  %v5065_v54 = vld [vmem:[%s5543_s0 + $0x90] ss:$8 sps:$4 sm:$0xff]  }
 0x48a   :  { %3644 = vmatprep.subr.bf16.mxu0 %v1247_v27  ;;  %4077 = vmatpush3.bf16.msra.mxu1 %v4316_v32 }
 0x48b   :  { %4078 = vmatprep.subr.bf16.mxu1 %v4317_v7 }
 0x48d   :  { %3645 = vmatpush3.bf16.msra.mxu0 %v4888_v53  ;;  %v5059_v53 = vld [vmem:[%s5543_s0 + $0x94] ss:$8 sps:$4 sm:$0xff]  }
 0x48e   :  { %4079 = vmatpush3.bf16.msra.mxu1 %v4317_v7  ;;  %v4325_v7 = vld [vmem:[%s5553_s10 + $0x20] sm:$0xff]  }
 0x48f   :  { %4080 = vmatprep.subr.bf16.mxu1 %v4318_v9 }
 0x490   :  { %1281 = vmatmul.mubr.bf16.vlgmr.msra.gmra.mrb[112].mxu0 %v4954_v31 }
 0x491   :  { %1288 = vmatprep.mubr.bf16.mxu0 %v4963_v33 }
 0x492   :  { %4081 = vmatpush3.bf16.msra.mxu1 %v4318_v9 }
 0x493   :  { %4082 = vmatprep.subr.bf16.mxu1 %v4319_v13 }
 0x496   :  { %4083 = vmatpush3.bf16.msra.mxu1 %v4319_v13 }
 0x497   :  { %4084 = vmatprep.subr.bf16.mxu1 %v4320_v14 }
 0x498   :  { %1289 = vmatmul.mubr.bf16.gmra.mrb[116].mxu0 %v4969_v34 }
 0x499   :  { %1296 = vmatprep.mubr.bf16.mxu0 %v4975_v35 }
 0x49a   :  { %4085 = vmatpush3.bf16.msra.mxu1 %v4320_v14 }
 0x49b   :  { %4118 = vmatprep.subr.bf16.mxu1 %v4321_v2 }
 0x4a0   :  { %1297 = vmatmul.mubr.bf16.gmra.mrb[120].mxu0 %v4981_v36 }
 0x4a1   :  { %1304 = vmatprep.mubr.bf16.mxu0 %v4987_v37 }
 0x4a8   :  { %1305 = vmatmul.mubr.bf16.gmra.mrb[124].mxu0 %v4993_v38 }
 0x4a9   :  { %1312 = vmatprep.mubr.bf16.mxu0 %v4999_v39 }
 0x4b0   :  { %1313 = vmatmul.mubr.bf16.gmra.mrb[128].mxu0 %v5005_v40 }
 0x4b1   :  { %1320 = vmatprep.mubr.bf16.mxu0 %v5011_v41 }
 0x4b8   :  { %1321 = vmatmul.mubr.bf16.gmra.mrb[132].mxu0 %v5017_v42 }
 0x4b9   :  { %1328 = vmatprep.mubr.bf16.mxu0 %v5023_v44 }
 0x4c0   :  { %1329 = vmatmul.mubr.bf16.gmra.mrb[136].mxu0 %v5029_v45 }
 0x4c1   :  { %1336 = vmatprep.mubr.bf16.mxu0 %v5035_v48 }
 0x4c8   :  { %1337 = vmatmul.mubr.bf16.gmra.mrb[140].mxu0 %v5041_v49 }
 0x4c9   :  { %1344 = vmatprep.mubr.bf16.mxu0 %v5047_v51 }
 0x4d0   :  { %1345 = vmatmul.mubr.bf16.gmra.mrb[144].mxu0 %v5053_v52 }
 0x4d1   :  { %1352 = vmatprep.mubr.bf16.mxu0 %v5059_v53 }
 0x4d8   :  { %1353 = vmatmul.mubr.bf16.gmra.mrb[148].mxu0 %v5065_v54 }
 0x4d9   :  { %1360 = vmatprep.mubr.bf16.mxu0 %v5071_v55 }
 0x4e0   :  { %1361 = vmatmul.mubr.bf16.gmra.mrb[152].mxu0 %v5077_v0 }
 0x4e1   :  { %1368 = vmatprep.mubr.bf16.mxu0 %v5083_v1 }
 0x4e8   :  { %1369 = vmatmul.mubr.bf16.gmra.mrb[156].mxu0 %v5095_v10 }
 0x4e9   :  { %1376 = vmatprep.mubr.bf16.mxu0 %v5101_v12 }
 0x4f0   :  { %1377 = vmatmul.mubr.bf16.gmra.mrb[160].mxu0 %v5113_v15 }
 0x4f1   :  { %1384 = vmatprep.mubr.bf16.mxu0 %v5119_v16 }
 0x4f8   :  { %1385 = vmatmul.mubr.bf16.gmra.mrb[164].mxu0 %v5125_v21 }
 0x4f9   :  { %1392 = vmatprep.mubr.bf16.mxu0 %v5131_v11 }
 0x500   :  { %1393 = vmatmul.mubr.bf16.gmra.mrb[168].mxu0 %v5137_v25 }
 0x501   :  { %1400 = vmatprep.mubr.bf16.mxu0 %v5143_v3 }
 0x508   :  { %1401 = vmatmul.mubr.bf16.gmra.mrb[172].mxu0 %v5149_v47 }
 0x509   :  { %1985 = vmatprep.mubr.bf16.mxu0 %v4846_v60 }
 0x563   :  { %v3646_v50 = vpop.f32.mrb[112].mxu0 }
 0x564   :  { %v3647_v56 = vpop.f32.mrb[113].mxu0 }
 0x565   :  { %v3648_v57 = vadd.f32 %v3647_v56, %v3646_v50  ;;  %v3649_v58 = vpop.f32.mrb[114].mxu0 }
 0x566   :  { %v3650_v59 = vpop.f32.mrb[115].mxu0 }
 0x567   :  { %v3651_v61 = vadd.f32 %v3650_v59, %v3649_v58  ;;  %v4327_v59 = vld [vmem:[%s5553_s10 + $0x30] sm:$0xff]  }
 0x569   :  { %v5156_v63 = vpack.c.bf16 %v3651_v61, %v3648_v57 }
 0x56b   :  { %v3652_v4 = vpop.f32.mrb[116].mxu0  ;;  %4086 = vmatprep.mubr.bf16.mxu1 %v5156_v63 }
 0x56c   :  { %v3653_v5 = vpop.f32.mrb[117].mxu0 }
 0x56d   :  { %v3654_v23 = vadd.f32 %v3653_v5, %v3652_v4  ;;  %v3655_v6 = vpop.f32.mrb[118].mxu0 }
 0x56e   :  { %v3656_v60 = vpop.f32.mrb[119].mxu0 }
 0x56f   :  { %v3657_v22 = vadd.f32 %v3656_v60, %v3655_v6 }
 0x571   :  { %v5159_v46 = vpack.c.bf16 %v3657_v22, %v3654_v23  ;;  %v4328_v23 = vld [vmem:[%s5553_s10 + $0x38] sm:$0xff]  }
 0x573   :  { %v3658_v43 = vpop.f32.mrb[120].mxu0  ;;  %4087 = vmatmul.mubr.bf16.vlgmr.msra.gmra.mrb[80].mxu1 %v5159_v46 }
 0x574   :  { %v3659_v17 = vpop.f32.mrb[121].mxu0  ;;  %4119 = vmatpush3.bf16.msra.mxu1 %v4321_v2  ;;  %v4326_v2 = vld [vmem:[%s5553_s10 + $0x28] sm:$0xff]  }
 0x575   :  { %v3660_v18 = vadd.f32 %v3659_v17, %v3658_v43  ;;  %v3661_v19 = vpop.f32.mrb[122].mxu0  ;;  %4120 = vmatprep.subr.bf16.mxu1 %v4322_v8 }
 0x576   :  { %v3662_v24 = vpop.f32.mrb[123].mxu0 }
 0x577   :  { %v3663_v26 = vadd.f32 %v3662_v24, %v3661_v19 }
 0x578   :  { %4121 = vmatpush3.bf16.msra.mxu1 %v4322_v8 }
 0x579   :  { %v5168_v27 = vpack.c.bf16 %v3663_v26, %v3660_v18  ;;  %4122 = vmatprep.subr.bf16.mxu1 %v4323_v20 }
 0x57b   :  { %v3664_v29 = vpop.f32.mrb[124].mxu0  ;;  %4090 = vmatprep.mubr.bf16.mxu1 %v5168_v27 }
 0x57c   :  { %v3665_v30 = vpop.f32.mrb[125].mxu0  ;;  %4123 = vmatpush3.bf16.msra.mxu1 %v4323_v20 }
 0x57d   :  { %v3666_v62 = vadd.f32 %v3665_v30, %v3664_v29  ;;  %v3667_v32 = vpop.f32.mrb[126].mxu0  ;;  %4124 = vmatprep.subr.bf16.mxu1 %v4324_v28 }
 0x57e   :  { %v3668_v9 = vpop.f32.mrb[127].mxu0 }
 0x57f   :  { %v3669_v13 = vadd.f32 %v3668_v9, %v3667_v32 }
 0x580   :  { %4125 = vmatpush3.bf16.msra.mxu1 %v4324_v28 }
 0x581   :  { %v5177_v14 = vpack.c.bf16 %v3669_v13, %v3666_v62  ;;  %4126 = vmatprep.subr.bf16.mxu1 %v4325_v7 }
 0x583   :  { %v3670_v50 = vpop.f32.mrb[128].mxu0  ;;  %4091 = vmatmul.mubr.bf16.gmra.mrb[84].mxu1 %v5177_v14 }
 0x584   :  { %v3671_v56 = vpop.f32.mrb[129].mxu0  ;;  %4127 = vmatpush3.bf16.msra.mxu1 %v4325_v7 }
 0x585   :  { %v3672_v57 = vadd.f32 %v3671_v56, %v3670_v50  ;;  %v3673_v58 = vpop.f32.mrb[130].mxu0  ;;  %4128 = vmatprep.subr.bf16.mxu1 %v4326_v2 }
 0x586   :  { %v3674_v61 = vpop.f32.mrb[131].mxu0 }
 0x587   :  { %v3675_v4 = vadd.f32 %v3674_v61, %v3673_v58 }
 0x588   :  { %4129 = vmatpush3.bf16.msra.mxu1 %v4326_v2 }
 0x589   :  { %v5186_v5 = vpack.c.bf16 %v3675_v4, %v3672_v57  ;;  %4130 = vmatprep.subr.bf16.mxu1 %v4327_v59 }
 0x58b   :  { %v3676_v6 = vpop.f32.mrb[132].mxu0  ;;  %4094 = vmatprep.mubr.bf16.mxu1 %v5186_v5 }
 0x58c   :  { %v3677_v60 = vpop.f32.mrb[133].mxu0  ;;  %4131 = vmatpush3.bf16.msra.mxu1 %v4327_v59 }
 0x58d   :  { %v3678_v22 = vadd.f32 %v3677_v60, %v3676_v6  ;;  %v3679_v8 = vpop.f32.mrb[134].mxu0  ;;  %4132 = vmatprep.subr.bf16.mxu1 %v4328_v23 }
 0x58e   :  { %v3680_v43 = vpop.f32.mrb[135].mxu0 }
 0x58f   :  { %v3681_v17 = vadd.f32 %v3680_v43, %v3679_v8 }
 0x590   :  { %4133 = vmatpush3.bf16.msra.mxu1 %v4328_v23 }
 0x591   :  { %v5192_v18 = vpack.c.bf16 %v3681_v17, %v3678_v22 }
 0x593   :  { %v3682_v19 = vpop.f32.mrb[136].mxu0  ;;  %4095 = vmatmul.mubr.bf16.gmra.mrb[88].mxu1 %v5192_v18 }
 0x594   :  { %v3683_v20 = vpop.f32.mrb[137].mxu0 }
 0x595   :  { %v3684_v24 = vadd.f32 %v3683_v20, %v3682_v19  ;;  %v3685_v26 = vpop.f32.mrb[138].mxu0 }
 0x596   :  { %v3686_v28 = vpop.f32.mrb[139].mxu0 }
 0x597   :  { %v3687_v29 = vadd.f32 %v3686_v28, %v3685_v26 }
 0x599   :  { %v5195_v30 = vpack.c.bf16 %v3687_v29, %v3684_v24 }
 0x59b   :  { %v3688_v62 = vpop.f32.mrb[140].mxu0  ;;  %4098 = vmatprep.mubr.bf16.mxu1 %v5195_v30 }
 0x59c   :  { %v3689_v32 = vpop.f32.mrb[141].mxu0 }
 0x59d   :  { %v3690_v7 = vadd.f32 %v3689_v32, %v3688_v62  ;;  %v3691_v9 = vpop.f32.mrb[142].mxu0 }
 0x59e   :  { %v3692_v13 = vpop.f32.mrb[143].mxu0 }
 0x59f   :  { %v3693_v2 = vadd.f32 %v3692_v13, %v3691_v9 }
 0x5a1   :  { %v5198_v50 = vpack.c.bf16 %v3693_v2, %v3690_v7 }
 0x5a3   :  { %v3694_v56 = vpop.f32.mrb[144].mxu0  ;;  %4099 = vmatmul.mubr.bf16.gmra.mrb[92].mxu1 %v5198_v50 }
 0x5a4   :  { %v3695_v57 = vpop.f32.mrb[145].mxu0 }
 0x5a5   :  { %v3696_v58 = vadd.f32 %v3695_v57, %v3694_v56  ;;  %v3697_v59 = vpop.f32.mrb[146].mxu0 }
 0x5a6   :  { %v3698_v61 = vpop.f32.mrb[147].mxu0 }
 0x5a7   :  { %v3699_v4 = vadd.f32 %v3698_v61, %v3697_v59 }
 0x5a9   :  { %v5201_v23 = vpack.c.bf16 %v3699_v4, %v3696_v58 }
 0x5ab   :  { %v3700_v6 = vpop.f32.mrb[148].mxu0  ;;  %4102 = vmatprep.mubr.bf16.mxu1 %v5201_v23 }
 0x5ac   :  { %v3701_v60 = vpop.f32.mrb[149].mxu0 }
 0x5ad   :  { %v3702_v22 = vadd.f32 %v3701_v60, %v3700_v6  ;;  %v3703_v8 = vpop.f32.mrb[150].mxu0 }
 0x5ae   :  { %v3704_v43 = vpop.f32.mrb[151].mxu0 }
 0x5af   :  { %v3705_v17 = vadd.f32 %v3704_v43, %v3703_v8 }
 0x5b1   :  { %v1418_v19 = vpack.c.bf16 %v3705_v17, %v3702_v22 }
 0x5b3   :  { %4103 = vmatmul.mubr.bf16.gmra.mrb[96].mxu1 %v1418_v19  ;;  %v3706_v20 = vpop.f32.mrb[152].mxu0 }
 0x5b4   :  { %v3707_v24 = vpop.f32.mrb[153].mxu0 }
 0x5b5   :  { %v3708_v26 = vadd.f32 %v3707_v24, %v3706_v20  ;;  %v3709_v28 = vpop.f32.mrb[154].mxu0 }
 0x5b6   :  { %v3710_v29 = vpop.f32.mrb[155].mxu0 }
 0x5b7   :  { %v3711_v62 = vadd.f32 %v3710_v29, %v3709_v28 }
 0x5b9   :  { %v1419_v32 = vpack.c.bf16 %v3711_v62, %v3708_v26 }
 0x5bb   :  { %v3712_v7 = vpop.f32.mrb[156].mxu0  ;;  %4106 = vmatprep.mubr.bf16.mxu1 %v1419_v32 }
 0x5bc   :  { %v3713_v9 = vpop.f32.mrb[157].mxu0 }
 0x5bd   :  { %v3714_v13 = vadd.f32 %v3713_v9, %v3712_v7  ;;  %v3715_v2 = vpop.f32.mrb[158].mxu0 }
 0x5be   :  { %v3716_v56 = vpop.f32.mrb[159].mxu0 }
 0x5bf   :  { %v3717_v57 = vadd.f32 %v3716_v56, %v3715_v2 }
 0x5c1   :  { %v1420_v58 = vpack.c.bf16 %v3717_v57, %v3714_v13 }
 0x5c3   :  { %4107 = vmatmul.mubr.bf16.gmra.mrb[100].mxu1 %v1420_v58  ;;  %v3718_v59 = vpop.f32.mrb[160].mxu0 }
 0x5c4   :  { %v3719_v61 = vpop.f32.mrb[161].mxu0 }
 0x5c5   :  { %v3720_v4 = vadd.f32 %v3719_v61, %v3718_v59  ;;  %v3721_v6 = vpop.f32.mrb[162].mxu0 }
 0x5c6   :  { %v3722_v60 = vpop.f32.mrb[163].mxu0 }
 0x5c7   :  { %v3723_v22 = vadd.f32 %v3722_v60, %v3721_v6 }
 0x5c9   :  { %v1421_v8 = vpack.c.bf16 %v3723_v22, %v3720_v4 }
 0x5cb   :  { %v3724_v43 = vpop.f32.mrb[164].mxu0  ;;  %4110 = vmatprep.mubr.bf16.mxu1 %v1421_v8 }
 0x5cc   :  { %v3725_v17 = vpop.f32.mrb[165].mxu0 }
 0x5cd   :  { %v3726_v20 = vadd.f32 %v3725_v17, %v3724_v43  ;;  %v3727_v24 = vpop.f32.mrb[166].mxu0 }
 0x5ce   :  { %v3728_v26 = vpop.f32.mrb[167].mxu0 }
 0x5cf   :  { %v3729_v28 = vadd.f32 %v3728_v26, %v3727_v24 }
 0x5d1   :  { %v1422_v29 = vpack.c.bf16 %v3729_v28, %v3726_v20  ;;  %v4331_v28 = vld [vmem:[%s5551_s8 + $0x10] sm:$0xff]  }
 0x5d3   :  { %4111 = vmatmul.mubr.bf16.gmra.mrb[104].mxu1 %v1422_v29  ;;  %v3730_v62 = vpop.f32.mrb[168].mxu0 }
 0x5d4   :  { %v3731_v7 = vpop.f32.mrb[169].mxu0 }
 0x5d5   :  { %v3732_v9 = vadd.f32 %v3731_v7, %v3730_v62  ;;  %v3733_v13 = vpop.f32.mrb[170].mxu0  ;;  %v4333_v7 = vld [vmem:[%s5551_s8 + $0x20] sm:$0xff]  }
 0x5d6   :  { %v3734_v2 = vpop.f32.mrb[171].mxu0 }
 0x5d7   :  { %v3735_v56 = vadd.f32 %v3734_v2, %v3733_v13 }
 0x5d9   :  { %v1423_v57 = vpack.c.bf16 %v3735_v56, %v3732_v9 }
 0x5db   :  { %v3736_v59 = vpop.f32.mrb[172].mxu0  ;;  %4114 = vmatprep.mubr.bf16.mxu1 %v1423_v57 }
 0x5dc   :  { %v3737_v61 = vpop.f32.mrb[173].mxu0 }
 0x5dd   :  { %v3738_v4 = vadd.f32 %v3737_v61, %v3736_v59  ;;  %v3739_v6 = vpop.f32.mrb[174].mxu0 }
 0x5de   :  { %v3740_v60 = vpop.f32.mrb[175].mxu0 }
 0x5df   :  { %v3741_v22 = vadd.f32 %v3740_v60, %v3739_v6 }
 0x5e1   :  { %v1424_v43 = vpack.c.bf16 %v3741_v22, %v3738_v4  ;;  %v4334_v4 = vld [vmem:[%s5551_s8 + $0x28] sm:$0xff]  }
 0x5e3   :  { %4115 = vmatmul.mubr.bf16.gmra.mrb[108].mxu1 %v1424_v43 }
 0x5e4   :  { %4134 = vmatprep.mubr.bf16.mxu1 %v5156_v63  ;;  %v5216_v63 = vld [vmem:[%s5550_s7] ss:$0 sm:$0xff] }
 0x5eb   :  { %4135 = vmatmul.mubr.bf16.vlgmr.msra.gmra.mrb[112].mxu1 %v5159_v46 }
 0x5ec   :  { %4138 = vmatprep.mubr.bf16.mxu1 %v5168_v27  ;;  %v4329_v27 = vld [vmem:[%s5551_s8] sm:$0xff]  }
 0x5ed   :  { %4166 = vmatprep.subr.bf16.mxu1 %v4329_v27 }
 0x5ee   :  { %4167 = vmatpush3.bf16.msra.mxu1 %v4329_v27 }
 0x5f3   :  { %4139 = vmatmul.mubr.bf16.gmra.mrb[116].mxu1 %v5177_v14 }
 0x5f4   :  { %4142 = vmatprep.mubr.bf16.mxu1 %v5186_v5 }
 0x5fb   :  { %4143 = vmatmul.mubr.bf16.gmra.mrb[120].mxu1 %v5192_v18 }
 0x5fc   :  { %4146 = vmatprep.mubr.bf16.mxu1 %v5195_v30 }
 0x603   :  { %4147 = vmatmul.mubr.bf16.gmra.mrb[124].mxu1 %v5198_v50 }
 0x604   :  { %4150 = vmatprep.mubr.bf16.mxu1 %v5201_v23 }
 0x60b   :  { %4151 = vmatmul.mubr.bf16.gmra.mrb[128].mxu1 %v1418_v19 }
 0x60c   :  { %4154 = vmatprep.mubr.bf16.mxu1 %v1419_v32  ;;  %v4330_v32 = vld [vmem:[%s5551_s8 + $0x8] sm:$0xff]  }
 0x60d   :  { %4168 = vmatprep.subr.bf16.mxu1 %v4330_v32 }
 0x60e   :  { %4169 = vmatpush3.bf16.msra.mxu1 %v4330_v32 }
 0x60f   :  { %4170 = vmatprep.subr.bf16.mxu1 %v4331_v28 }
 0x612   :  { %4171 = vmatpush3.bf16.msra.mxu1 %v4331_v28 }
 0x613   :  { %4155 = vmatmul.mubr.bf16.gmra.mrb[132].mxu1 %v1420_v58 }
 0x614   :  { %4158 = vmatprep.mubr.bf16.mxu1 %v1421_v8 }
 0x61b   :  { %4159 = vmatmul.mubr.bf16.gmra.mrb[136].mxu1 %v1422_v29  ;;  %v4332_v29 = vld [vmem:[%s5551_s8 + $0x18] sm:$0xff]  }
 0x61c   :  { %4162 = vmatprep.mubr.bf16.mxu1 %v1423_v57  ;;  %4172 = vmatprep.subr.bf16.mxu1 %v4332_v29 }
 0x61d   :  { %4173 = vmatpush3.bf16.msra.mxu1 %v4332_v29 }
 0x61e   :  { %4174 = vmatprep.subr.bf16.mxu1 %v4333_v7 }
 0x621   :  { %4175 = vmatpush3.bf16.msra.mxu1 %v4333_v7 }
 0x622   :  { %4176 = vmatprep.subr.bf16.mxu1 %v4334_v4 }
 0x623   :  { %4163 = vmatmul.mubr.bf16.gmra.mrb[140].mxu1 %v1424_v43 }
 0x625   :  { %4177 = vmatpush3.bf16.msra.mxu1 %v4334_v4 }
 0x646   :  { %v4088_v46 = vpop.f32.mrb[80].mxu1 }
 0x647   :  { %v1539_v14 = vadd.f32 %v4088_v46, %v5216_v63  ;;  %v1530_v5 = vpop.f32.mrb[81].mxu1 }
 0x648   :  { %v1531_v18 = vadd.f32 %v5216_v63, %v1530_v5  ;;  %v4089_v30 = vpop.f32.mrb[82].mxu1  ;;  %v4336_v5 = vld [vmem:[%s5551_s8 + $0x38] sm:$0xff]  }
 0x649   :  { %v1542_v50 = vadd.f32 %v4089_v30, %v5216_v63  ;;  %v1533_v23 = vpop.f32.mrb[83].mxu1  ;;  %v1659_v58 = vmax.f32 %v1539_v14, 0.0  ;;  %v4335_v14 = vld [vmem:[%s5551_s8 + $0x30] sm:$0xff]  }
 0x64a   :  { %v1534_v19 = vadd.f32 %v5216_v63, %v1533_v23  ;;  %v1657_v17 = vmax.f32 %v1531_v18, 0.0  ;;  %4178 = vmatprep.subr.bf16.mxu1 %v4335_v14 }
 0x64b   :  { %v1660_v8 = vmax.f32 %v1542_v50, 0.0  ;;  %4179 = vmatpush3.bf16.msra.mxu1 %v4335_v14 }
 0x64c   :  { %v1658_v20 = vmax.f32 %v1534_v19, 0.0  ;;  %4180 = vmatprep.subr.bf16.mxu1 %v4336_v5 }
 0x64d   :  { %v5228_v24 = vpack.c.bf16 %v1660_v8, %v1659_v58 }
 0x64e   :  { %v5230_v26 = vpack.c.bf16 %v1658_v20, %v1657_v17 }
 0x64f   :  { %4181 = vmatpush3.bf16.msra.mxu1 %v4336_v5 }
 0x656   :  { %v4092_v62 = vpop.f32.mrb[84].mxu1 }
 0x657   :  { %v1555_v9 = vadd.f32 %v4092_v62, %v5216_v63  ;;  %v1546_v13 = vpop.f32.mrb[85].mxu1 }
 0x658   :  { %v1547_v2 = vadd.f32 %v5216_v63, %v1546_v13  ;;  %v4093_v56 = vpop.f32.mrb[86].mxu1 }
 0x659   :  { %v1558_v57 = vadd.f32 %v4093_v56, %v5216_v63  ;;  %v1549_v59 = vpop.f32.mrb[87].mxu1  ;;  %v1663_v6 = vmax.f32 %v1555_v9, 0.0 }
 0x65a   :  { %v1550_v61 = vadd.f32 %v5216_v63, %v1549_v59  ;;  %v1661_v22 = vmax.f32 %v1547_v2, 0.0 }
 0x65b   :  { %v1664_v60 = vmax.f32 %v1558_v57, 0.0 }
 0x65c   :  { %v1662_v43 = vmax.f32 %v1550_v61, 0.0 }
 0x65d   :  { %v5248_v46 = vpack.c.bf16 %v1664_v60, %v1663_v6 }
 0x65e   :  { %v5250_v27 = vpack.c.bf16 %v1662_v43, %v1661_v22 }
 0x666   :  { %v4096_v18 = vpop.f32.mrb[88].mxu1 }
 0x667   :  { %v1571_v30 = vadd.f32 %v4096_v18, %v5216_v63  ;;  %v1562_v50 = vpop.f32.mrb[89].mxu1 }
 0x668   :  { %v1563_v23 = vadd.f32 %v5216_v63, %v1562_v50  ;;  %v4097_v19 = vpop.f32.mrb[90].mxu1 }
 0x669   :  { %v1574_v32 = vadd.f32 %v4097_v19, %v5216_v63  ;;  %v1565_v58 = vpop.f32.mrb[91].mxu1  ;;  %v1667_v17 = vmax.f32 %v1571_v30, 0.0 }
 0x66a   :  { %v1566_v8 = vadd.f32 %v5216_v63, %v1565_v58  ;;  %v1665_v28 = vmax.f32 %v1563_v23, 0.0 }
 0x66b   :  { %v1668_v20 = vmax.f32 %v1574_v32, 0.0 }
 0x66c   :  { %v1666_v29 = vmax.f32 %v1566_v8, 0.0 }
 0x66d   :  { %v5262_v62 = vpack.c.bf16 %v1668_v20, %v1667_v17 }
 0x66e   :  { %v5264_v7 = vpack.c.bf16 %v1666_v29, %v1665_v28 }
 0x676   :  { %v4100_v9 = vpop.f32.mrb[92].mxu1 }
 0x677   :  { %v1587_v13 = vadd.f32 %v4100_v9, %v5216_v63  ;;  %v1578_v2 = vpop.f32.mrb[93].mxu1 }
 0x678   :  { %v1579_v56 = vadd.f32 %v5216_v63, %v1578_v2  ;;  %v4101_v57 = vpop.f32.mrb[94].mxu1 }
 0x679   :  { %v1590_v59 = vadd.f32 %v4101_v57, %v5216_v63  ;;  %v1581_v61 = vpop.f32.mrb[95].mxu1  ;;  %v1671_v6 = vmax.f32 %v1587_v13, 0.0 }
 0x67a   :  { %v1582_v4 = vadd.f32 %v5216_v63, %v1581_v61  ;;  %v1669_v22 = vmax.f32 %v1579_v56, 0.0 }
 0x67b   :  { %v1672_v60 = vmax.f32 %v1590_v59, 0.0 }
 0x67c   :  { %v1670_v43 = vmax.f32 %v1582_v4, 0.0 }
 0x67d   :  { %v5270_v14 = vpack.c.bf16 %v1672_v60, %v1671_v6 }
 0x67e   :  { %v5272_v5 = vpack.c.bf16 %v1670_v43, %v1669_v22 }
 0x686   :  { %v4104_v18 = vpop.f32.mrb[96].mxu1 }
 0x687   :  { %v1603_v30 = vadd.f32 %v4104_v18, %v5216_v63  ;;  %v1594_v50 = vpop.f32.mrb[97].mxu1 }
 0x688   :  { %v1595_v23 = vadd.f32 %v5216_v63, %v1594_v50  ;;  %v4105_v19 = vpop.f32.mrb[98].mxu1 }
 0x689   :  { %v1606_v32 = vadd.f32 %v4105_v19, %v5216_v63  ;;  %v1597_v58 = vpop.f32.mrb[99].mxu1  ;;  %v1675_v17 = vmax.f32 %v1603_v30, 0.0 }
 0x68a   :  { %v1598_v8 = vadd.f32 %v5216_v63, %v1597_v58  ;;  %v1673_v28 = vmax.f32 %v1595_v23, 0.0 }
 0x68b   :  { %v1676_v20 = vmax.f32 %v1606_v32, 0.0 }
 0x68c   :  { %v1674_v29 = vmax.f32 %v1598_v8, 0.0 }
 0x68d   :  { %v1698_v9 = vpack.c.bf16 %v1676_v20, %v1675_v17 }
 0x68e   :  { %v1697_v13 = vpack.c.bf16 %v1674_v29, %v1673_v28 }
 0x690   :  { %3790 = vmatprep.subr.bf16.mxu0 %v1697_v13 }
 0x691   :  { %3791 = vmatpush3.bf16.msra.mxu0 %v5230_v26 }
 0x692   :  { %3792 = vmatprep.subr.bf16.mxu0 %v1698_v9 }
 0x695   :  { %3793 = vmatpush3.bf16.msra.mxu0 %v5228_v24 }
 0x696   :  { %v4108_v2 = vpop.f32.mrb[100].mxu1 }
 0x697   :  { %v1619_v56 = vadd.f32 %v4108_v2, %v5216_v63  ;;  %v1610_v57 = vpop.f32.mrb[101].mxu1 }
 0x698   :  { %v1611_v59 = vadd.f32 %v5216_v63, %v1610_v57  ;;  %v4109_v61 = vpop.f32.mrb[102].mxu1 }
 0x699   :  { %v1622_v4 = vadd.f32 %v4109_v61, %v5216_v63  ;;  %v1613_v6 = vpop.f32.mrb[103].mxu1  ;;  %v1679_v22 = vmax.f32 %v1619_v56, 0.0 }
 0x69a   :  { %v1614_v60 = vadd.f32 %v5216_v63, %v1613_v6  ;;  %v1677_v18 = vmax.f32 %v1611_v59, 0.0 }
 0x69b   :  { %v1680_v43 = vmax.f32 %v1622_v4, 0.0 }
 0x69c   :  { %v1678_v30 = vmax.f32 %v1614_v60, 0.0 }
 0x69d   :  { %v1700_v26 = vpack.c.bf16 %v1680_v43, %v1679_v22 }
 0x69e   :  { %v1699_v50 = vpack.c.bf16 %v1678_v30, %v1677_v18 }
 0x6a0   :  { %3794 = vmatprep.subr.bf16.mxu0 %v1699_v50 }
 0x6a1   :  { %3795 = vmatpush3.bf16.msra.mxu0 %v5250_v27 }
 0x6a2   :  { %3796 = vmatprep.subr.bf16.mxu0 %v1700_v26 }
 0x6a5   :  { %3797 = vmatpush3.bf16.msra.mxu0 %v5248_v46 }
 0x6a6   :  { %v4112_v24 = vpop.f32.mrb[104].mxu1 }
 0x6a7   :  { %v1635_v23 = vadd.f32 %v4112_v24, %v5216_v63  ;;  %v1626_v19 = vpop.f32.mrb[105].mxu1 }
 0x6a8   :  { %v1627_v32 = vadd.f32 %v5216_v63, %v1626_v19  ;;  %v4113_v58 = vpop.f32.mrb[106].mxu1 }
 0x6a9   :  { %v1638_v8 = vadd.f32 %v4113_v58, %v5216_v63  ;;  %v1629_v17 = vpop.f32.mrb[107].mxu1  ;;  %v1683_v28 = vmax.f32 %v1635_v23, 0.0 }
 0x6aa   :  { %v1630_v20 = vadd.f32 %v5216_v63, %v1629_v17  ;;  %v1681_v9 = vmax.f32 %v1627_v32, 0.0 }
 0x6ab   :  { %v1684_v29 = vmax.f32 %v1638_v8, 0.0 }
 0x6ac   :  { %v1682_v13 = vmax.f32 %v1630_v20, 0.0 }
 0x6ad   :  { %v1702_v27 = vpack.c.bf16 %v1684_v29, %v1683_v28 }
 0x6ae   :  { %v1701_v2 = vpack.c.bf16 %v1682_v13, %v1681_v9 }
 0x6b0   :  { %3798 = vmatprep.subr.bf16.mxu0 %v1701_v2 }
 0x6b1   :  { %3799 = vmatpush3.bf16.msra.mxu0 %v5264_v7 }
 0x6b2   :  { %3800 = vmatprep.subr.bf16.mxu0 %v1702_v27 }
 0x6b5   :  { %3801 = vmatpush3.bf16.msra.mxu0 %v5262_v62  ;;  %v5299_v62 = vld [vmem:[%s5554_s11] ss:$0 sm:$0xff] }
 0x6b6   :  { %v4116_v46 = vpop.f32.mrb[108].mxu1 }
 0x6b7   :  { %v1651_v56 = vadd.f32 %v4116_v46, %v5216_v63  ;;  %v1642_v57 = vpop.f32.mrb[109].mxu1 }
 0x6b8   :  { %v1643_v59 = vadd.f32 %v5216_v63, %v1642_v57  ;;  %v4117_v61 = vpop.f32.mrb[110].mxu1 }
 0x6b9   :  { %v1654_v4 = vadd.f32 %v4117_v61, %v5216_v63  ;;  %v1645_v6 = vpop.f32.mrb[111].mxu1  ;;  %v1687_v22 = vmax.f32 %v1651_v56, 0.0 }
 0x6ba   :  { %v1646_v60 = vadd.f32 %v5216_v63, %v1645_v6  ;;  %v1685_v18 = vmax.f32 %v1643_v59, 0.0 }
 0x6bb   :  { %v1688_v43 = vmax.f32 %v1654_v4, 0.0 }
 0x6bc   :  { %v1686_v30 = vmax.f32 %v1646_v60, 0.0 }
 0x6bd   :  { %v1704_v7 = vpack.c.bf16 %v1688_v43, %v1687_v22 }
 0x6be   :  { %v1703_v26 = vpack.c.bf16 %v1686_v30, %v1685_v18  ;;  %v4136_v50 = vpop.f32.mrb[112].mxu1 }
 0x6bf   :  { %v1819_v24 = vadd.f32 %v4136_v50, %v5299_v62  ;;  %v1810_v23 = vpop.f32.mrb[113].mxu1 }
 0x6c0   :  { %v1811_v19 = vadd.f32 %v5299_v62, %v1810_v23  ;;  %v4137_v32 = vpop.f32.mrb[114].mxu1  ;;  %3802 = vmatprep.subr.bf16.mxu0 %v1703_v26 }
 0x6c1   :  { %v1822_v63 = vadd.f32 %v4137_v32, %v5299_v62  ;;  %v1813_v58 = vpop.f32.mrb[115].mxu1  ;;  %3803 = vmatpush3.bf16.msra.mxu0 %v5272_v5 }
 0x6c2   :  { %v1814_v8 = vadd.f32 %v5299_v62, %v1813_v58  ;;  %3804 = vmatprep.subr.bf16.mxu0 %v1704_v7 }
 0x6c3   :  { %v5306_v17 = vpack.c.bf16 %v1822_v63, %v1819_v24 }
 0x6c4   :  { %v5308_v20 = vpack.c.bf16 %v1814_v8, %v1811_v19 }
 0x6c5   :  { %3805 = vmatpush3.bf16.msra.mxu0 %v5270_v14 }
 0x6c6   :  { %v4140_v28 = vpop.f32.mrb[116].mxu1 }
 0x6c7   :  { %v1835_v29 = vadd.f32 %v4140_v28, %v5299_v62  ;;  %v1826_v9 = vpop.f32.mrb[117].mxu1 }
 0x6c8   :  { %v1827_v13 = vadd.f32 %v5299_v62, %v1826_v9  ;;  %v4141_v27 = vpop.f32.mrb[118].mxu1  ;;  %1986 = vmatmul.mubr.bf16.vlgmr.msra.gmra.mrb[176].mxu0 %v4954_v31 }
 0x6c9   :  { %v1838_v5 = vadd.f32 %v4141_v27, %v5299_v62  ;;  %v1829_v2 = vpop.f32.mrb[119].mxu1  ;;  %1993 = vmatprep.mubr.bf16.mxu0 %v4963_v33 }
 0x6ca   :  { %v1830_v46 = vadd.f32 %v5299_v62, %v1829_v2 }
 0x6cb   :  { %v5317_v56 = vpack.c.bf16 %v1838_v5, %v1835_v29 }
 0x6cc   :  { %v5319_v57 = vpack.c.bf16 %v1830_v46, %v1827_v13 }
 0x6ce   :  { %v4144_v14 = vpop.f32.mrb[120].mxu1 }
 0x6cf   :  { %v1851_v59 = vadd.f32 %v4144_v14, %v5299_v62  ;;  %v1842_v61 = vpop.f32.mrb[121].mxu1 }
 0x6d0   :  { %v1843_v4 = vadd.f32 %v5299_v62, %v1842_v61  ;;  %v4145_v6 = vpop.f32.mrb[122].mxu1  ;;  %1994 = vmatmul.mubr.bf16.gmra.mrb[180].mxu0 %v4969_v34 }
 0x6d1   :  { %v1854_v31 = vadd.f32 %v4145_v6, %v5299_v62  ;;  %v1845_v60 = vpop.f32.mrb[123].mxu1  ;;  %2001 = vmatprep.mubr.bf16.mxu0 %v4975_v35 }
 0x6d2   :  { %v1846_v33 = vadd.f32 %v5299_v62, %v1845_v60 }
 0x6d3   :  { %v5327_v22 = vpack.c.bf16 %v1854_v31, %v1851_v59 }
 0x6d4   :  { %v5329_v43 = vpack.c.bf16 %v1846_v33, %v1843_v4 }
 0x6d6   :  { %v4148_v18 = vpop.f32.mrb[124].mxu1 }
 0x6d7   :  { %v1867_v30 = vadd.f32 %v4148_v18, %v5299_v62  ;;  %v1858_v7 = vpop.f32.mrb[125].mxu1 }
 0x6d8   :  { %v1859_v26 = vadd.f32 %v5299_v62, %v1858_v7  ;;  %v4149_v50 = vpop.f32.mrb[126].mxu1  ;;  %2002 = vmatmul.mubr.bf16.gmra.mrb[184].mxu0 %v4981_v36 }
 0x6d9   :  { %v1870_v34 = vadd.f32 %v4149_v50, %v5299_v62  ;;  %v1861_v24 = vpop.f32.mrb[127].mxu1  ;;  %2009 = vmatprep.mubr.bf16.mxu0 %v4987_v37 }
 0x6da   :  { %v1862_v35 = vadd.f32 %v5299_v62, %v1861_v24 }
 0x6db   :  { %v5337_v23 = vpack.c.bf16 %v1870_v34, %v1867_v30 }
 0x6dc   :  { %v5339_v19 = vpack.c.bf16 %v1862_v35, %v1859_v26 }
 0x6de   :  { %v4152_v32 = vpop.f32.mrb[128].mxu1 }
 0x6df   :  { %v1883_v63 = vadd.f32 %v4152_v32, %v5299_v62  ;;  %v1874_v58 = vpop.f32.mrb[129].mxu1 }
 0x6e0   :  { %v4153_v8 = vpop.f32.mrb[130].mxu1  ;;  %2010 = vmatmul.mubr.bf16.gmra.mrb[188].mxu0 %v4993_v38  ;;  %v1875_v37 = vadd.f32 %v5299_v62, %v1874_v58 }
 0x6e1   :  { %v1886_v36 = vadd.f32 %v4153_v8, %v5299_v62  ;;  %v1877_v28 = vpop.f32.mrb[131].mxu1  ;;  %2017 = vmatprep.mubr.bf16.mxu0 %v4999_v39 }
 0x6e2   :  { %v1878_v29 = vadd.f32 %v5299_v62, %v1877_v28 }
 0x6e3   :  { %v5347_v9 = vpack.c.bf16 %v1886_v36, %v1883_v63 }
 0x6e4   :  { %v5349_v13 = vpack.c.bf16 %v1878_v29, %v1875_v37 }
 0x6e6   :  { %v4156_v27 = vpop.f32.mrb[132].mxu1  ;;  %3926 = vmatprep.subr.bf16.mxu1 %v5349_v13 }
 0x6e7   :  { %v1899_v5 = vadd.f32 %v4156_v27, %v5299_v62  ;;  %v1890_v2 = vpop.f32.mrb[133].mxu1 }
 0x6e8   :  { %v1891_v38 = vadd.f32 %v5299_v62, %v1890_v2  ;;  %v4157_v46 = vpop.f32.mrb[134].mxu1  ;;  %2018 = vmatmul.mubr.bf16.gmra.mrb[192].mxu0 %v5005_v40 }
 0x6e9   :  { %v1902_v39 = vadd.f32 %v4157_v46, %v5299_v62  ;;  %v1893_v14 = vpop.f32.mrb[135].mxu1  ;;  %2025 = vmatprep.mubr.bf16.mxu0 %v5011_v41 }
 0x6ea   :  { %v1894_v59 = vadd.f32 %v5299_v62, %v1893_v14 }
 0x6eb   :  { %v5358_v61 = vpack.c.bf16 %v1902_v39, %v1899_v5 }
 0x6ec   :  { %v5360_v4 = vpack.c.bf16 %v1894_v59, %v1891_v38 }
 0x6ee   :  { %v4160_v6 = vpop.f32.mrb[136].mxu1 }
 0x6ef   :  { %v1915_v31 = vadd.f32 %v4160_v6, %v5299_v62  ;;  %v1906_v60 = vpop.f32.mrb[137].mxu1 }
 0x6f0   :  { %v1907_v33 = vadd.f32 %v5299_v62, %v1906_v60  ;;  %v4161_v18 = vpop.f32.mrb[138].mxu1  ;;  %2026 = vmatmul.mubr.bf16.gmra.mrb[196].mxu0 %v5017_v42 }
 0x6f1   :  { %v1918_v40 = vadd.f32 %v4161_v18, %v5299_v62  ;;  %v1909_v30 = vpop.f32.mrb[139].mxu1  ;;  %2033 = vmatprep.mubr.bf16.mxu0 %v5023_v44 }
 0x6f2   :  { %v1910_v41 = vadd.f32 %v5299_v62, %v1909_v30 }
 0x6f3   :  { %v5368_v7 = vpack.c.bf16 %v1918_v40, %v1915_v31 }
 0x6f4   :  { %v5370_v26 = vpack.c.bf16 %v1910_v41, %v1907_v33 }
 0x6f6   :  { %v4164_v50 = vpop.f32.mrb[140].mxu1 }
 0x6f7   :  { %v1931_v34 = vadd.f32 %v4164_v50, %v5299_v62  ;;  %v1922_v24 = vpop.f32.mrb[141].mxu1 }
 0x6f8   :  { %v1923_v35 = vadd.f32 %v5299_v62, %v1922_v24  ;;  %v4165_v32 = vpop.f32.mrb[142].mxu1  ;;  %2034 = vmatmul.mubr.bf16.gmra.mrb[200].mxu0 %v5029_v45 }
 0x6f9   :  { %v1934_v42 = vadd.f32 %v4165_v32, %v5299_v62  ;;  %v1925_v63 = vpop.f32.mrb[143].mxu1  ;;  %2041 = vmatprep.mubr.bf16.mxu0 %v5035_v48 }
 0x6fa   :  { %v1926_v44 = vadd.f32 %v5299_v62, %v1925_v63 }
 0x6fb   :  { %v5378_v58 = vpack.c.bf16 %v1934_v42, %v1931_v34 }
 0x6fc   :  { %v5380_v8 = vpack.c.bf16 %v1926_v44, %v1923_v35 }
 0x700   :  { %2042 = vmatmul.mubr.bf16.gmra.mrb[204].mxu0 %v5041_v49 }
 0x701   :  { %2049 = vmatprep.mubr.bf16.mxu0 %v5047_v51 }
 0x708   :  { %2050 = vmatmul.mubr.bf16.gmra.mrb[208].mxu0 %v5053_v52 }
 0x709   :  { %2057 = vmatprep.mubr.bf16.mxu0 %v5059_v53 }
 0x710   :  { %2058 = vmatmul.mubr.bf16.gmra.mrb[212].mxu0 %v5065_v54 }
 0x711   :  { %2065 = vmatprep.mubr.bf16.mxu0 %v5071_v55 }
 0x718   :  { %2066 = vmatmul.mubr.bf16.gmra.mrb[216].mxu0 %v5077_v0 }
 0x719   :  { %2073 = vmatprep.mubr.bf16.mxu0 %v5083_v1 }
 0x720   :  { %2074 = vmatmul.mubr.bf16.gmra.mrb[220].mxu0 %v5095_v10 }
 0x721   :  { %2081 = vmatprep.mubr.bf16.mxu0 %v5101_v12 }
 0x728   :  { %2082 = vmatmul.mubr.bf16.gmra.mrb[224].mxu0 %v5113_v15 }
 0x729   :  { %2089 = vmatprep.mubr.bf16.mxu0 %v5119_v16 }
 0x730   :  { %2090 = vmatmul.mubr.bf16.gmra.mrb[228].mxu0 %v5125_v21 }
 0x731   :  { %2097 = vmatprep.mubr.bf16.mxu0 %v5131_v11 }
 0x738   :  { %2098 = vmatmul.mubr.bf16.gmra.mrb[232].mxu0 %v5137_v25 }
 0x739   :  { %2105 = vmatprep.mubr.bf16.mxu0 %v5143_v3 }
 0x740   :  { %2106 = vmatmul.mubr.bf16.gmra.mrb[236].mxu0 %v5149_v47 }
 0x79b   :  { %v3806_v45 = vpop.f32.mrb[176].mxu0 }
 0x79c   :  { %v3807_v48 = vpop.f32.mrb[177].mxu0 }
 0x79d   :  { %v3808_v49 = vadd.f32 %v3807_v48, %v3806_v45  ;;  %v3809_v51 = vpop.f32.mrb[178].mxu0 }
 0x79e   :  { %v3810_v52 = vpop.f32.mrb[179].mxu0 }
 0x79f   :  { %v3811_v53 = vadd.f32 %v3810_v52, %v3809_v51 }
 0x7a1   :  { %v2114_v54 = vpack.c.bf16 %v3811_v53, %v3808_v49 }
 0x7a3   :  { %v3812_v55 = vpop.f32.mrb[180].mxu0  ;;  %4182 = vmatprep.mubr.bf16.mxu1 %v2114_v54 }
 0x7a4   :  { %v3813_v0 = vpop.f32.mrb[181].mxu0 }
 0x7a5   :  { %v3814_v1 = vadd.f32 %v3813_v0, %v3812_v55  ;;  %v3815_v10 = vpop.f32.mrb[182].mxu0 }
 0x7a6   :  { %v3816_v12 = vpop.f32.mrb[183].mxu0 }
 0x7a7   :  { %v3817_v15 = vadd.f32 %v3816_v12, %v3815_v10 }
 0x7a9   :  { %v2115_v16 = vpack.c.bf16 %v3817_v15, %v3814_v1 }
 0x7ab   :  { %4183 = vmatmul.mubr.bf16.vlgmr.msra.gmra.mrb[144].mxu1 %v2115_v16  ;;  %v3818_v21 = vpop.f32.mrb[184].mxu0 }
 0x7ac   :  { %3927 = vmatpush3.bf16.xpose.msra.mxu1 %v5308_v20  ;;  %v3819_v11 = vpop.f32.mrb[185].mxu0 }
 0x7ad   :  { %3928 = vmatprep.subr.bf16.mxu1 %v5347_v9  ;;  %v3820_v25 = vadd.f32 %v3819_v11, %v3818_v21  ;;  %v3821_v3 = vpop.f32.mrb[186].mxu0 }
 0x7ae   :  { %v3822_v47 = vpop.f32.mrb[187].mxu0 }
 0x7af   :  { %v3823_v62 = vadd.f32 %v3822_v47, %v3821_v3 }
 0x7b1   :  { %v2116_v36 = vpack.c.bf16 %v3823_v62, %v3820_v25 }
 0x7b3   :  { %v3824_v28 = vpop.f32.mrb[188].mxu0  ;;  %4186 = vmatprep.mubr.bf16.mxu1 %v2116_v36 }
 0x7b4   :  { %3929 = vmatpush3.bf16.xpose.msra.mxu1 %v5306_v17  ;;  %v3825_v37 = vpop.f32.mrb[189].mxu0 }
 0x7b5   :  { %3930 = vmatprep.subr.bf16.mxu1 %v5360_v4  ;;  %v3826_v29 = vadd.f32 %v3825_v37, %v3824_v28  ;;  %v3827_v27 = vpop.f32.mrb[190].mxu0 }
 0x7b6   :  { %v3828_v5 = vpop.f32.mrb[191].mxu0 }
 0x7b7   :  { %v3829_v2 = vadd.f32 %v3828_v5, %v3827_v27 }
 0x7b9   :  { %v2117_v38 = vpack.c.bf16 %v3829_v2, %v3826_v29 }
 0x7bb   :  { %v3830_v46 = vpop.f32.mrb[192].mxu0  ;;  %4187 = vmatmul.mubr.bf16.gmra.mrb[148].mxu1 %v2117_v38 }
 0x7bc   :  { %3931 = vmatpush3.bf16.xpose.msra.mxu1 %v5319_v57  ;;  %v3831_v39 = vpop.f32.mrb[193].mxu0 }
 0x7bd   :  { %3932 = vmatprep.subr.bf16.mxu1 %v5358_v61  ;;  %v3832_v14 = vadd.f32 %v3831_v39, %v3830_v46  ;;  %v3833_v59 = vpop.f32.mrb[194].mxu0 }
 0x7be   :  { %v3834_v6 = vpop.f32.mrb[195].mxu0 }
 0x7bf   :  { %v3835_v31 = vadd.f32 %v3834_v6, %v3833_v59 }
 0x7c1   :  { %v2118_v60 = vpack.c.bf16 %v3835_v31, %v3832_v14 }
 0x7c3   :  { %v3836_v33 = vpop.f32.mrb[196].mxu0  ;;  %4190 = vmatprep.mubr.bf16.mxu1 %v2118_v60 }
 0x7c4   :  { %3933 = vmatpush3.bf16.xpose.msra.mxu1 %v5317_v56  ;;  %v3837_v18 = vpop.f32.mrb[197].mxu0 }
 0x7c5   :  { %3934 = vmatprep.subr.bf16.mxu1 %v5370_v26  ;;  %v3838_v40 = vadd.f32 %v3837_v18, %v3836_v33  ;;  %v3839_v30 = vpop.f32.mrb[198].mxu0 }
 0x7c6   :  { %v3840_v41 = vpop.f32.mrb[199].mxu0 }
 0x7c7   :  { %v3841_v50 = vadd.f32 %v3840_v41, %v3839_v30 }
 0x7c9   :  { %v2119_v34 = vpack.c.bf16 %v3841_v50, %v3838_v40 }
 0x7cb   :  { %v3842_v24 = vpop.f32.mrb[200].mxu0  ;;  %4191 = vmatmul.mubr.bf16.gmra.mrb[152].mxu1 %v2119_v34 }
 0x7cc   :  { %3935 = vmatpush3.bf16.xpose.msra.mxu1 %v5329_v43  ;;  %v3843_v35 = vpop.f32.mrb[201].mxu0 }
 0x7cd   :  { %3936 = vmatprep.subr.bf16.mxu1 %v5368_v7  ;;  %v3844_v32 = vadd.f32 %v3843_v35, %v3842_v24  ;;  %v3845_v42 = vpop.f32.mrb[202].mxu0 }
 0x7ce   :  { %v3846_v63 = vpop.f32.mrb[203].mxu0 }
 0x7cf   :  { %v3847_v44 = vadd.f32 %v3846_v63, %v3845_v42 }
 0x7d1   :  { %v2120_v45 = vpack.c.bf16 %v3847_v44, %v3844_v32 }
 0x7d3   :  { %v3848_v48 = vpop.f32.mrb[204].mxu0  ;;  %4194 = vmatprep.mubr.bf16.mxu1 %v2120_v45 }
 0x7d4   :  { %3937 = vmatpush3.bf16.xpose.msra.mxu1 %v5327_v22  ;;  %v3849_v49 = vpop.f32.mrb[205].mxu0 }
 0x7d5   :  { %3938 = vmatprep.subr.bf16.mxu1 %v5380_v8  ;;  %v3850_v51 = vadd.f32 %v3849_v49, %v3848_v48  ;;  %v3851_v52 = vpop.f32.mrb[206].mxu0 }
 0x7d6   :  { %v3852_v53 = vpop.f32.mrb[207].mxu0 }
 0x7d7   :  { %v3853_v54 = vadd.f32 %v3852_v53, %v3851_v52 }
 0x7d9   :  { %v2121_v55 = vpack.c.bf16 %v3853_v54, %v3850_v51 }
 0x7db   :  { %v3854_v0 = vpop.f32.mrb[208].mxu0  ;;  %4195 = vmatmul.mubr.bf16.gmra.mrb[156].mxu1 %v2121_v55 }
 0x7dc   :  { %3939 = vmatpush3.bf16.xpose.msra.mxu1 %v5339_v19  ;;  %v3855_v1 = vpop.f32.mrb[209].mxu0 }
 0x7dd   :  { %3940 = vmatprep.subr.bf16.mxu1 %v5378_v58  ;;  %v3856_v10 = vadd.f32 %v3855_v1, %v3854_v0  ;;  %v3857_v12 = vpop.f32.mrb[210].mxu0 }
 0x7de   :  { %v3858_v15 = vpop.f32.mrb[211].mxu0 }
 0x7df   :  { %v3859_v16 = vadd.f32 %v3858_v15, %v3857_v12 }
 0x7e1   :  { %v2122_v21 = vpack.c.bf16 %v3859_v16, %v3856_v10 }
 0x7e3   :  { %v3860_v11 = vpop.f32.mrb[212].mxu0  ;;  %4198 = vmatprep.mubr.bf16.mxu1 %v2122_v21 }
 0x7e4   :  { %3941 = vmatpush3.bf16.xpose.msra.mxu1 %v5337_v23  ;;  %v3861_v25 = vpop.f32.mrb[213].mxu0 }
 0x7e5   :  { %v3862_v3 = vadd.f32 %v3861_v25, %v3860_v11  ;;  %v3863_v47 = vpop.f32.mrb[214].mxu0 }
 0x7e6   :  { %v3864_v62 = vpop.f32.mrb[215].mxu0 }
 0x7e7   :  { %v3865_v36 = vadd.f32 %v3864_v62, %v3863_v47 }
 0x7e9   :  { %v2123_v28 = vpack.c.bf16 %v3865_v36, %v3862_v3 }
 0x7eb   :  { %v3866_v37 = vpop.f32.mrb[216].mxu0  ;;  %4199 = vmatmul.mubr.bf16.gmra.mrb[160].mxu1 %v2123_v28 }
 0x7ec   :  { %v3867_v29 = vpop.f32.mrb[217].mxu0 }
 0x7ed   :  { %v3868_v27 = vadd.f32 %v3867_v29, %v3866_v37  ;;  %v3869_v5 = vpop.f32.mrb[218].mxu0 }
 0x7ee   :  { %v3870_v2 = vpop.f32.mrb[219].mxu0 }
 0x7ef   :  { %v3871_v38 = vadd.f32 %v3870_v2, %v3869_v5 }
 0x7f1   :  { %v2124_v46 = vpack.c.bf16 %v3871_v38, %v3868_v27 }
 0x7f3   :  { %v3872_v39 = vpop.f32.mrb[220].mxu0  ;;  %4202 = vmatprep.mubr.bf16.mxu1 %v2124_v46 }
 0x7f4   :  { %v3873_v14 = vpop.f32.mrb[221].mxu0 }
 0x7f5   :  { %v3874_v59 = vadd.f32 %v3873_v14, %v3872_v39  ;;  %v3875_v6 = vpop.f32.mrb[222].mxu0 }
 0x7f6   :  { %v3876_v31 = vpop.f32.mrb[223].mxu0 }
 0x7f7   :  { %v3877_v60 = vadd.f32 %v3876_v31, %v3875_v6 }
 0x7f9   :  { %v2125_v33 = vpack.c.bf16 %v3877_v60, %v3874_v59 }
 0x7fb   :  { %v3878_v18 = vpop.f32.mrb[224].mxu0  ;;  %4203 = vmatmul.mubr.bf16.gmra.mrb[164].mxu1 %v2125_v33 }
 0x7fc   :  { %v3879_v40 = vpop.f32.mrb[225].mxu0 }
 0x7fd   :  { %v3880_v30 = vadd.f32 %v3879_v40, %v3878_v18  ;;  %v3881_v41 = vpop.f32.mrb[226].mxu0 }
 0x7fe   :  { %v3882_v50 = vpop.f32.mrb[227].mxu0 }
 0x7ff   :  { %v3883_v34 = vadd.f32 %v3882_v50, %v3881_v41 }
 0x801   :  { %v2126_v24 = vpack.c.bf16 %v3883_v34, %v3880_v30 }
 0x803   :  { %v3884_v35 = vpop.f32.mrb[228].mxu0  ;;  %4206 = vmatprep.mubr.bf16.mxu1 %v2126_v24 }
 0x804   :  { %v3885_v32 = vpop.f32.mrb[229].mxu0 }
 0x805   :  { %v3886_v42 = vadd.f32 %v3885_v32, %v3884_v35  ;;  %v3887_v63 = vpop.f32.mrb[230].mxu0 }
 0x806   :  { %v3888_v44 = vpop.f32.mrb[231].mxu0 }
 0x807   :  { %v3889_v45 = vadd.f32 %v3888_v44, %v3887_v63 }
 0x809   :  { %v2127_v48 = vpack.c.bf16 %v3889_v45, %v3886_v42 }
 0x80b   :  { %v3890_v49 = vpop.f32.mrb[232].mxu0  ;;  %4207 = vmatmul.mubr.bf16.gmra.mrb[168].mxu1 %v2127_v48 }
 0x80c   :  { %v3891_v51 = vpop.f32.mrb[233].mxu0 }
 0x80d   :  { %v3892_v52 = vadd.f32 %v3891_v51, %v3890_v49  ;;  %v3893_v53 = vpop.f32.mrb[234].mxu0 }
 0x80e   :  { %v3894_v54 = vpop.f32.mrb[235].mxu0 }
 0x80f   :  { %v3895_v55 = vadd.f32 %v3894_v54, %v3893_v53 }
 0x811   :  { %v2128_v0 = vpack.c.bf16 %v3895_v55, %v3892_v52 }
 0x813   :  { %v3896_v1 = vpop.f32.mrb[236].mxu0  ;;  %4210 = vmatprep.mubr.bf16.mxu1 %v2128_v0 }
 0x814   :  { %v3897_v10 = vpop.f32.mrb[237].mxu0 }
 0x815   :  { %v3898_v12 = vadd.f32 %v3897_v10, %v3896_v1  ;;  %v3899_v15 = vpop.f32.mrb[238].mxu0 }
 0x816   :  { %v3900_v16 = vpop.f32.mrb[239].mxu0 }
 0x817   :  { %v3901_v21 = vadd.f32 %v3900_v16, %v3899_v15 }
 0x819   :  { %v2129_v11 = vpack.c.bf16 %v3901_v21, %v3898_v12 }
 0x81b   :  { %4211 = vmatmul.mubr.bf16.gmra.mrb[172].mxu1 %v2129_v11 }
 0x81c   :  { %3942 = vmatprep.mubr.bf16.mxu1 %v5308_v20 }
 0x823   :  { %3943 = vmatmul.mubr.bf16.vlgmr.msra.gmra.mrb[176].mxu1 %v5308_v20  ;;  %v5442_v20 = vld [vmem:[%s5552_s9] ss:$0 sm:$0xff] }
 0x824   :  { %3944 = vmatprep.mubr.bf16.mxu1 %v5306_v17 }
 0x82b   :  { %3945 = vmatmul.mubr.bf16.gmra.mrb[180].mxu1 %v5306_v17 }
 0x82c   :  { %3946 = vmatprep.mubr.bf16.mxu1 %v5319_v57 }
 0x833   :  { %3947 = vmatmul.mubr.bf16.gmra.mrb[184].mxu1 %v5319_v57 }
 0x834   :  { %3948 = vmatprep.mubr.bf16.mxu1 %v5317_v56 }
 0x83b   :  { %3949 = vmatmul.mubr.bf16.gmra.mrb[188].mxu1 %v5317_v56 }
 0x83c   :  { %3950 = vmatprep.mubr.bf16.mxu1 %v5329_v43 }
 0x843   :  { %3951 = vmatmul.mubr.bf16.gmra.mrb[192].mxu1 %v5329_v43 }
 0x844   :  { %3952 = vmatprep.mubr.bf16.mxu1 %v5327_v22 }
 0x84b   :  { %3953 = vmatmul.mubr.bf16.gmra.mrb[196].mxu1 %v5327_v22 }
 0x84c   :  { %3954 = vmatprep.mubr.bf16.mxu1 %v5339_v19 }
 0x853   :  { %3955 = vmatmul.mubr.bf16.gmra.mrb[200].mxu1 %v5339_v19 }
 0x854   :  { %3956 = vmatprep.mubr.bf16.mxu1 %v5337_v23 }
 0x85b   :  { %3957 = vmatmul.mubr.bf16.gmra.mrb[204].mxu1 %v5337_v23 }
 0x85c   :  { %3958 = vmatprep.mubr.bf16.mxu1 %v5349_v13 }
 0x863   :  { %3959 = vmatmul.mubr.bf16.gmra.mrb[208].mxu1 %v5349_v13 }
 0x864   :  { %3960 = vmatprep.mubr.bf16.mxu1 %v5347_v9 }
 0x86b   :  { %3961 = vmatmul.mubr.bf16.gmra.mrb[212].mxu1 %v5347_v9 }
 0x86c   :  { %3962 = vmatprep.mubr.bf16.mxu1 %v5360_v4 }
 0x873   :  { %3963 = vmatmul.mubr.bf16.gmra.mrb[216].mxu1 %v5360_v4 }
 0x874   :  { %3964 = vmatprep.mubr.bf16.mxu1 %v5358_v61 }
 0x87b   :  { %3965 = vmatmul.mubr.bf16.gmra.mrb[220].mxu1 %v5358_v61 }
 0x87c   :  { %3966 = vmatprep.mubr.bf16.mxu1 %v5370_v26 }
 0x87e   :  { %v4184_v17 = vpop.f32.mrb[144].mxu1 }
 0x87f   :  { %v2235_v56 = vpop.f32.mrb[145].mxu1  ;;  %v2244_v22 = vadd.f32 %v4184_v17, %v5442_v20 }
 0x880   :  { %v4185_v57 = vpop.f32.mrb[146].mxu1  ;;  %v2236_v19 = vadd.f32 %v5442_v20, %v2235_v56 }
 0x881   :  { %v2247_v43 = vadd.f32 %v4185_v57, %v5442_v20  ;;  %v2238_v23 = vpop.f32.mrb[147].mxu1 }
 0x882   :  { %v2239_v9 = vadd.f32 %v5442_v20, %v2238_v23 }
 0x883   :  { %3967 = vmatmul.mubr.bf16.gmra.mrb[224].mxu1 %v5370_v26  ;;  %v3256_v13 = vpack.c.bf16 %v2247_v43, %v2244_v22 }
 0x884   :  { %3968 = vmatprep.mubr.bf16.mxu1 %v5368_v7  ;;  %v3251_v61 = vpack.c.bf16 %v2239_v9, %v2236_v19 }
 0x885   :  { %3343 = vst [vmem:[%s5555_s12 + $0x8] sm:$0xff] %v3256_v13  }
 0x886   :  { %3252 = vst [vmem:[%s5555_s12] sm:$0xff] %v3251_v61  }
 0x88b   :  { %3969 = vmatmul.mubr.bf16.gmra.mrb[228].mxu1 %v5368_v7 }
 0x88c   :  { %3970 = vmatprep.mubr.bf16.mxu1 %v5380_v8 }
 0x88e   :  { %v4188_v4 = vpop.f32.mrb[148].mxu1 }
 0x88f   :  { %v2251_v25 = vpop.f32.mrb[149].mxu1  ;;  %v2260_v26 = vadd.f32 %v4188_v4, %v5442_v20 }
 0x890   :  { %v4189_v3 = vpop.f32.mrb[150].mxu1  ;;  %v2252_v36 = vadd.f32 %v5442_v20, %v2251_v25 }
 0x891   :  { %v2263_v47 = vadd.f32 %v4189_v3, %v5442_v20  ;;  %v2254_v62 = vpop.f32.mrb[151].mxu1 }
 0x892   :  { %v2255_v28 = vadd.f32 %v5442_v20, %v2254_v62 }
 0x893   :  { %3971 = vmatmul.mubr.bf16.gmra.mrb[232].mxu1 %v5380_v8  ;;  %v3266_v37 = vpack.c.bf16 %v2263_v47, %v2260_v26 }
 0x894   :  { %3972 = vmatprep.mubr.bf16.mxu1 %v5378_v58  ;;  %v3261_v7 = vpack.c.bf16 %v2255_v28, %v2252_v36 }
 0x895   :  { %3345 = vst [vmem:[%s5555_s12 + $0x18] sm:$0xff] %v3266_v37  }
 0x896   :  { %3344 = vst [vmem:[%s5555_s12 + $0x10] sm:$0xff] %v3261_v7  }
 0x89b   :  { %3973 = vmatmul.mubr.bf16.gmra.mrb[236].mxu1 %v5378_v58 }
 0x89e   :  { %v4192_v29 = vpop.f32.mrb[152].mxu1 }
 0x89f   :  { %v2267_v27 = vpop.f32.mrb[153].mxu1  ;;  %v2276_v2 = vadd.f32 %v4192_v29, %v5442_v20 }
 0x8a0   :  { %v4193_v5 = vpop.f32.mrb[154].mxu1  ;;  %v2268_v46 = vadd.f32 %v5442_v20, %v2267_v27 }
 0x8a1   :  { %v2279_v8 = vadd.f32 %v4193_v5, %v5442_v20  ;;  %v2270_v38 = vpop.f32.mrb[155].mxu1 }
 0x8a2   :  { %v2271_v39 = vadd.f32 %v5442_v20, %v2270_v38 }
 0x8a3   :  { %v3276_v14 = vpack.c.bf16 %v2279_v8, %v2276_v2 }
 0x8a4   :  { %v3271_v59 = vpack.c.bf16 %v2271_v39, %v2268_v46 }
 0x8a5   :  { %3347 = vst [vmem:[%s5555_s12 + $0x28] sm:$0xff] %v3276_v14  }
 0x8a6   :  { %3346 = vst [vmem:[%s5555_s12 + $0x20] sm:$0xff] %v3271_v59  }
 0x8ae   :  { %v4196_v58 = vpop.f32.mrb[156].mxu1 }
 0x8af   :  { %v2283_v6 = vpop.f32.mrb[157].mxu1  ;;  %v2292_v60 = vadd.f32 %v4196_v58, %v5442_v20 }
 0x8b0   :  { %v4197_v31 = vpop.f32.mrb[158].mxu1  ;;  %v2284_v40 = vadd.f32 %v5442_v20, %v2283_v6 }
 0x8b1   :  { %v2295_v33 = vadd.f32 %v4197_v31, %v5442_v20  ;;  %v2286_v18 = vpop.f32.mrb[159].mxu1 }
 0x8b2   :  { %v2287_v30 = vadd.f32 %v5442_v20, %v2286_v18 }
 0x8b3   :  { %v3286_v41 = vpack.c.bf16 %v2295_v33, %v2292_v60 }
 0x8b4   :  { %v3281_v50 = vpack.c.bf16 %v2287_v30, %v2284_v40 }
 0x8b5   :  { %3349 = vst [vmem:[%s5555_s12 + $0x38] sm:$0xff] %v3286_v41  }
 0x8b6   :  { %3348 = vst [vmem:[%s5555_s12 + $0x30] sm:$0xff] %v3281_v50  }
 0x8be   :  { %v4200_v34 = vpop.f32.mrb[160].mxu1 }
 0x8bf   :  { %v2299_v24 = vpop.f32.mrb[161].mxu1  ;;  %v2308_v32 = vadd.f32 %v4200_v34, %v5442_v20 }
 0x8c0   :  { %v4201_v35 = vpop.f32.mrb[162].mxu1  ;;  %v2300_v44 = vadd.f32 %v5442_v20, %v2299_v24 }
 0x8c1   :  { %v2311_v42 = vadd.f32 %v4201_v35, %v5442_v20  ;;  %v2302_v63 = vpop.f32.mrb[163].mxu1 }
 0x8c2   :  { %v2303_v45 = vadd.f32 %v5442_v20, %v2302_v63 }
 0x8c3   :  { %v3296_v48 = vpack.c.bf16 %v2311_v42, %v2308_v32 }
 0x8c4   :  { %v3291_v49 = vpack.c.bf16 %v2303_v45, %v2300_v44 }
 0x8c5   :  { %3351 = vst [vmem:[%s5555_s12 + $0x48] sm:$0xff] %v3296_v48  }
 0x8c6   :  { %3350 = vst [vmem:[%s5555_s12 + $0x40] sm:$0xff] %v3291_v49  }
 0x8ce   :  { %v4204_v51 = vpop.f32.mrb[164].mxu1 }
 0x8cf   :  { %v2315_v52 = vpop.f32.mrb[165].mxu1  ;;  %v2324_v54 = vadd.f32 %v4204_v51, %v5442_v20 }
 0x8d0   :  { %v4205_v53 = vpop.f32.mrb[166].mxu1  ;;  %v2316_v1 = vadd.f32 %v5442_v20, %v2315_v52 }
 0x8d1   :  { %v2327_v55 = vadd.f32 %v4205_v53, %v5442_v20  ;;  %v2318_v0 = vpop.f32.mrb[167].mxu1 }
 0x8d2   :  { %v2319_v10 = vadd.f32 %v5442_v20, %v2318_v0 }
 0x8d3   :  { %v3306_v12 = vpack.c.bf16 %v2327_v55, %v2324_v54 }
 0x8d4   :  { %v3301_v15 = vpack.c.bf16 %v2319_v10, %v2316_v1 }
 0x8d5   :  { %3353 = vst [vmem:[%s5555_s12 + $0x58] sm:$0xff] %v3306_v12  }
 0x8d6   :  { %3352 = vst [vmem:[%s5555_s12 + $0x50] sm:$0xff] %v3301_v15  }
 0x8de   :  { %v4208_v16 = vpop.f32.mrb[168].mxu1 }
 0x8df   :  { %v2331_v21 = vpop.f32.mrb[169].mxu1  ;;  %v2340_v17 = vadd.f32 %v4208_v16, %v5442_v20 }
 0x8e0   :  { %v4209_v11 = vpop.f32.mrb[170].mxu1  ;;  %v2332_v22 = vadd.f32 %v5442_v20, %v2331_v21 }
 0x8e1   :  { %v2343_v56 = vadd.f32 %v4209_v11, %v5442_v20  ;;  %v2334_v57 = vpop.f32.mrb[171].mxu1 }
 0x8e2   :  { %v2335_v43 = vadd.f32 %v5442_v20, %v2334_v57 }
 0x8e3   :  { %v3316_v23 = vpack.c.bf16 %v2343_v56, %v2340_v17 }
 0x8e4   :  { %v3311_v19 = vpack.c.bf16 %v2335_v43, %v2332_v22 }
 0x8e5   :  { %3355 = vst [vmem:[%s5555_s12 + $0x68] sm:$0xff] %v3316_v23  }
 0x8e6   :  { %3354 = vst [vmem:[%s5555_s12 + $0x60] sm:$0xff] %v3311_v19  }
 0x8ee   :  { %v4212_v9 = vpop.f32.mrb[172].mxu1 }
 0x8ef   :  { %v2347_v13 = vpop.f32.mrb[173].mxu1  ;;  %v2356_v4 = vadd.f32 %v4212_v9, %v5442_v20 }
 0x8f0   :  { %v4213_v61 = vpop.f32.mrb[174].mxu1  ;;  %v2348_v26 = vadd.f32 %v5442_v20, %v2347_v13 }
 0x8f1   :  { %v2359_v25 = vadd.f32 %v4213_v61, %v5442_v20  ;;  %v2350_v3 = vpop.f32.mrb[175].mxu1 }
 0x8f2   :  { %v2351_v47 = vadd.f32 %v5442_v20, %v2350_v3 }
 0x8f3   :  { %v3326_v62 = vpack.c.bf16 %v2359_v25, %v2356_v4 }
 0x8f4   :  { %v3321_v36 = vpack.c.bf16 %v2351_v47, %v2348_v26 }
 0x8f5   :  { %3357 = vst [vmem:[%s5555_s12 + $0x78] sm:$0xff] %v3326_v62  }
 0x8f6   :  { %3356 = vst [vmem:[%s5555_s12 + $0x70] sm:$0xff] %v3321_v36   ;;  %v2700_v28 = vpop.f32.mrb[176].mxu1  ;;  %s4393_s12 = smov [#allocation2]  }
 0x8f7   :  { %2859 = vst [vmem:[#allocation2] sm:$0xff] %v2700_v28  ;;  %v2702_v37 = vpop.f32.mrb[177].mxu1  ;;  %s2930_s18 = sshll.u32 %s4393_s12, 4  ;;  %s2931_s18 = int_to_ptr.vmem [resolvable:$true] %s2930_s18 }
 0x8f8   :  { %2860 = vst [vmem:[#allocation2 + $0x8] sm:$0xff] %v2702_v37  ;;  %v2704_v7 = vpop.f32.mrb[178].mxu1  ;;  %s4369_s2 = scalar_lea.vmem %s2931_s18, 8192  ;;  %p4374_p1 = scmp.lt.s32.totalorder %s2931_s18, %s2931_s18 }
 0x8f9   :  { %2861 = vst [vmem:[#allocation2 + $0x10] sm:$0xff] %v2704_v7  ;;  %v2706_v29 = vpop.f32.mrb[179].mxu1  ;;  %p4370_p0 = scmp.ne.s32.totalorder %s2931_s18, %s4369_s2  ;;  %p4375_p2 = scmp.lt.s32.totalorder %s4369_s2, %s4369_s2 }
 0x8fa   :  { %2862 = vst [vmem:[#allocation2 + $0x18] sm:$0xff] %v2706_v29 }
 0x8fb   :  { %p4376_p3 = por %p4375_p2, %p4374_p1 }
 0x8fd   :  { %p4377_p4 = pnand %p4376_p3, %p4370_p0 }
 0x8fe   :  { %v2710_v27 = vpop.f32.mrb[180].mxu1 }
 0x8ff   :  { %2863 = vst [vmem:[#allocation2 + $0x20] sm:$0xff] %v2710_v27  ;;  %v2712_v20 = vpop.f32.mrb[181].mxu1 }
 0x900   :  { %2864 = vst [vmem:[#allocation2 + $0x28] sm:$0xff] %v2712_v20  ;;  %v2714_v5 = vpop.f32.mrb[182].mxu1 }
 0x901   :  { %2865 = vst [vmem:[#allocation2 + $0x30] sm:$0xff] %v2714_v5  ;;  %v2716_v2 = vpop.f32.mrb[183].mxu1 }
 0x902   :  { %2866 = vst [vmem:[#allocation2 + $0x38] sm:$0xff] %v2716_v2 }
 0x906   :  { %v2720_v8 = vpop.f32.mrb[184].mxu1 }
 0x907   :  { %2867 = vst [vmem:[#allocation2 + $0x40] sm:$0xff] %v2720_v8  ;;  %v2722_v38 = vpop.f32.mrb[185].mxu1 }
 0x908   :  { %2868 = vst [vmem:[#allocation2 + $0x48] sm:$0xff] %v2722_v38  ;;  %v2724_v46 = vpop.f32.mrb[186].mxu1 }
 0x909   :  { %2869 = vst [vmem:[#allocation2 + $0x50] sm:$0xff] %v2724_v46  ;;  %v2726_v39 = vpop.f32.mrb[187].mxu1 }
 0x90a   :  { %2870 = vst [vmem:[#allocation2 + $0x58] sm:$0xff] %v2726_v39 }
 0x90e   :  { %v2730_v14 = vpop.f32.mrb[188].mxu1 }
 0x90f   :  { %2871 = vst [vmem:[#allocation2 + $0x60] sm:$0xff] %v2730_v14  ;;  %v2732_v59 = vpop.f32.mrb[189].mxu1 }
 0x910   :  { %2872 = vst [vmem:[#allocation2 + $0x68] sm:$0xff] %v2732_v59  ;;  %v2734_v58 = vpop.f32.mrb[190].mxu1 }
 0x911   :  { %2873 = vst [vmem:[#allocation2 + $0x70] sm:$0xff] %v2734_v58  ;;  %v2736_v6 = vpop.f32.mrb[191].mxu1 }
 0x912   :  { %2874 = vst [vmem:[#allocation2 + $0x78] sm:$0xff] %v2736_v6 }
 0x916   :  { %v2740_v31 = vpop.f32.mrb[192].mxu1 }
 0x917   :  { %2875 = vst [vmem:[#allocation2 + $0x80] sm:$0xff] %v2740_v31  ;;  %v2742_v60 = vpop.f32.mrb[193].mxu1 }
 0x918   :  { %2876 = vst [vmem:[#allocation2 + $0x88] sm:$0xff] %v2742_v60  ;;  %v2744_v33 = vpop.f32.mrb[194].mxu1 }
 0x919   :  { %2877 = vst [vmem:[#allocation2 + $0x90] sm:$0xff] %v2744_v33  ;;  %v2746_v18 = vpop.f32.mrb[195].mxu1 }
 0x91a   :  { %2878 = vst [vmem:[#allocation2 + $0x98] sm:$0xff] %v2746_v18 }
 0x91e   :  { %v2750_v40 = vpop.f32.mrb[196].mxu1 }
 0x91f   :  { %2879 = vst [vmem:[#allocation2 + $0xa0] sm:$0xff] %v2750_v40  ;;  %v2752_v30 = vpop.f32.mrb[197].mxu1 }
 0x920   :  { %2880 = vst [vmem:[#allocation2 + $0xa8] sm:$0xff] %v2752_v30  ;;  %v2754_v41 = vpop.f32.mrb[198].mxu1 }
 0x921   :  { %2881 = vst [vmem:[#allocation2 + $0xb0] sm:$0xff] %v2754_v41  ;;  %v2756_v50 = vpop.f32.mrb[199].mxu1 }
 0x922   :  { %2882 = vst [vmem:[#allocation2 + $0xb8] sm:$0xff] %v2756_v50 }
 0x926   :  { %v2760_v34 = vpop.f32.mrb[200].mxu1 }
 0x927   :  { %2883 = vst [vmem:[#allocation2 + $0xc0] sm:$0xff] %v2760_v34  ;;  %v2762_v24 = vpop.f32.mrb[201].mxu1 }
 0x928   :  { %2884 = vst [vmem:[#allocation2 + $0xc8] sm:$0xff] %v2762_v24  ;;  %v2764_v35 = vpop.f32.mrb[202].mxu1 }
 0x929   :  { %2885 = vst [vmem:[#allocation2 + $0xd0] sm:$0xff] %v2764_v35  ;;  %v2766_v32 = vpop.f32.mrb[203].mxu1 }
 0x92a   :  { %2886 = vst [vmem:[#allocation2 + $0xd8] sm:$0xff] %v2766_v32 }
 0x92e   :  { %v2770_v42 = vpop.f32.mrb[204].mxu1 }
 0x92f   :  { %2887 = vst [vmem:[#allocation2 + $0xe0] sm:$0xff] %v2770_v42  ;;  %v2772_v63 = vpop.f32.mrb[205].mxu1 }
 0x930   :  { %2888 = vst [vmem:[#allocation2 + $0xe8] sm:$0xff] %v2772_v63  ;;  %v2774_v44 = vpop.f32.mrb[206].mxu1 }
 0x931   :  { %2889 = vst [vmem:[#allocation2 + $0xf0] sm:$0xff] %v2774_v44  ;;  %v2776_v45 = vpop.f32.mrb[207].mxu1 }
 0x932   :  { %2890 = vst [vmem:[#allocation2 + $0xf8] sm:$0xff] %v2776_v45 }
 0x936   :  { %v2780_v48 = vpop.f32.mrb[208].mxu1 }
 0x937   :  { %2891 = vst [vmem:[#allocation2 + $0x100] sm:$0xff] %v2780_v48  ;;  %v2782_v49 = vpop.f32.mrb[209].mxu1 }
 0x938   :  { %2892 = vst [vmem:[#allocation2 + $0x108] sm:$0xff] %v2782_v49  ;;  %v2784_v51 = vpop.f32.mrb[210].mxu1 }
 0x939   :  { %2893 = vst [vmem:[#allocation2 + $0x110] sm:$0xff] %v2784_v51  ;;  %v2786_v52 = vpop.f32.mrb[211].mxu1 }
 0x93a   :  { %2894 = vst [vmem:[#allocation2 + $0x118] sm:$0xff] %v2786_v52 }
 0x93e   :  { %v2790_v53 = vpop.f32.mrb[212].mxu1 }
 0x93f   :  { %2895 = vst [vmem:[#allocation2 + $0x120] sm:$0xff] %v2790_v53  ;;  %v2792_v54 = vpop.f32.mrb[213].mxu1 }
 0x940   :  { %2896 = vst [vmem:[#allocation2 + $0x128] sm:$0xff] %v2792_v54  ;;  %v2794_v55 = vpop.f32.mrb[214].mxu1 }
 0x941   :  { %2897 = vst [vmem:[#allocation2 + $0x130] sm:$0xff] %v2794_v55  ;;  %v2796_v0 = vpop.f32.mrb[215].mxu1 }
 0x942   :  { %2898 = vst [vmem:[#allocation2 + $0x138] sm:$0xff] %v2796_v0 }
 0x946   :  { %v2800_v1 = vpop.f32.mrb[216].mxu1 }
 0x947   :  { %2899 = vst [vmem:[#allocation2 + $0x140] sm:$0xff] %v2800_v1  ;;  %v2802_v10 = vpop.f32.mrb[217].mxu1 }
 0x948   :  { %2900 = vst [vmem:[#allocation2 + $0x148] sm:$0xff] %v2802_v10  ;;  %v2804_v12 = vpop.f32.mrb[218].mxu1 }
 0x949   :  { %2901 = vst [vmem:[#allocation2 + $0x150] sm:$0xff] %v2804_v12  ;;  %v2806_v15 = vpop.f32.mrb[219].mxu1 }
 0x94a   :  { %2902 = vst [vmem:[#allocation2 + $0x158] sm:$0xff] %v2806_v15 }
 0x94e   :  { %v2810_v16 = vpop.f32.mrb[220].mxu1 }
 0x94f   :  { %2903 = vst [vmem:[#allocation2 + $0x160] sm:$0xff] %v2810_v16  ;;  %v2812_v21 = vpop.f32.mrb[221].mxu1 }
 0x950   :  { %2904 = vst [vmem:[#allocation2 + $0x168] sm:$0xff] %v2812_v21  ;;  %v2814_v11 = vpop.f32.mrb[222].mxu1 }
 0x951   :  { %2905 = vst [vmem:[#allocation2 + $0x170] sm:$0xff] %v2814_v11  ;;  %v2816_v17 = vpop.f32.mrb[223].mxu1 }
 0x952   :  { %2906 = vst [vmem:[#allocation2 + $0x178] sm:$0xff] %v2816_v17 }
 0x956   :  { %v2820_v56 = vpop.f32.mrb[224].mxu1 }
 0x957   :  { %2907 = vst [vmem:[#allocation2 + $0x180] sm:$0xff] %v2820_v56  ;;  %v2822_v57 = vpop.f32.mrb[225].mxu1 }
 0x958   :  { %2908 = vst [vmem:[#allocation2 + $0x188] sm:$0xff] %v2822_v57  ;;  %v2824_v22 = vpop.f32.mrb[226].mxu1 }
 0x959   :  { %2909 = vst [vmem:[#allocation2 + $0x190] sm:$0xff] %v2824_v22  ;;  %v2826_v43 = vpop.f32.mrb[227].mxu1 }
 0x95a   :  { %2910 = vst [vmem:[#allocation2 + $0x198] sm:$0xff] %v2826_v43 }
 0x95e   :  { %v2830_v23 = vpop.f32.mrb[228].mxu1 }
 0x95f   :  { %2911 = vst [vmem:[#allocation2 + $0x1a0] sm:$0xff] %v2830_v23  ;;  %v2832_v19 = vpop.f32.mrb[229].mxu1 }
 0x960   :  { %2912 = vst [vmem:[#allocation2 + $0x1a8] sm:$0xff] %v2832_v19  ;;  %v2834_v9 = vpop.f32.mrb[230].mxu1 }
 0x961   :  { %2913 = vst [vmem:[#allocation2 + $0x1b0] sm:$0xff] %v2834_v9  ;;  %v2836_v13 = vpop.f32.mrb[231].mxu1 }
 0x962   :  { %2914 = vst [vmem:[#allocation2 + $0x1b8] sm:$0xff] %v2836_v13 }
 0x966   :  { %v2840_v61 = vpop.f32.mrb[232].mxu1 }
 0x967   :  { %2915 = vst [vmem:[#allocation2 + $0x1c0] sm:$0xff] %v2840_v61  ;;  %v2842_v4 = vpop.f32.mrb[233].mxu1 }
 0x968   :  { %2916 = vst [vmem:[#allocation2 + $0x1c8] sm:$0xff] %v2842_v4  ;;  %v2844_v25 = vpop.f32.mrb[234].mxu1 }
 0x969   :  { %2917 = vst [vmem:[#allocation2 + $0x1d0] sm:$0xff] %v2844_v25  ;;  %v2846_v3 = vpop.f32.mrb[235].mxu1 }
 0x96a   :  { %2918 = vst [vmem:[#allocation2 + $0x1d8] sm:$0xff] %v2846_v3 }
 0x96e   :  { %v2850_v26 = vpop.f32.mrb[236].mxu1 }
 0x96f   :  { %2919 = vst [vmem:[#allocation2 + $0x1e0] sm:$0xff] %v2850_v26  ;;  %v2852_v47 = vpop.f32.mrb[237].mxu1 }
 0x970   :  { %2920 = vst [vmem:[#allocation2 + $0x1e8] sm:$0xff] %v2852_v47  ;;  %v2854_v62 = vpop.f32.mrb[238].mxu1 }
 0x971   :  { %2921 = vst [vmem:[#allocation2 + $0x1f0] sm:$0xff] %v2854_v62  ;;  %v2856_v36 = vpop.f32.mrb[239].mxu1 }
 0x972   :  { %2922 = vst [vmem:[#allocation2 + $0x1f8] sm:$0xff] %v2856_v36 }
 0x973   :  { %4380 = shalt.err (!%p4377_p4)
}
 0x974   :  { %s4381_s10 = scalar_lea.hbm %s5556_s13, 8192 }
 0x975   :  { %p4382_p5 = scmp.ne.s32.totalorder %s5556_s13, %s4381_s10  ;;  %p4385_p6 = scmp.lt.u32.totalorder %s4381_s10, %s5556_s13 }
 0x977   :  { %p4387_p7 = pnand %p4385_p6, %p4382_p5 }
 0x979   :  { %4390 = shalt.err (!%p4387_p7)
}
 0x97a   :  { %s4394_s14 = smov 256   ;;  %s4395_s4 = smov 16  }
 0x97b   :  { %2936 = dma.vmem_to_hbm [thread:$0]  %s2931_s18, 8192, %s5556_s13, [#allocation3], %s4394_s14, %s4394_s14, %s4395_s4  }
 0x97c   :  { %4391 = dma.done.wait [#allocation3], 8192  }
 0x97d   :  { %4392 = vsyncadd [#allocation3], 4294959104 }
 0x97e   :  { %2946 = vsyncpa [#allocation3], 1 }

</bundles_post_ra>
